<compile_context>
chip_gen: v7x
topology: tpu7x:2x2x1
jax: 0.10.0
libtpu: 0.0.40
codegen_flags: <defaults>
</compile_context>

<pallas_src>
import jax
import jax.numpy as jnp
from jax.experimental import pallas as pl
from jax.experimental.pallas import tpu as pltpu


# ------------------------------- fused kernel ------------------------------ #

def _fused_encoder_kernel(x_ref, s1_ref, b1_ref, w1_ref, b2_ref, w2_ref,
                          b3_ref, out_ref, pool_scr, h1_scr):
    """One image per grid step: bn1+relu -> maxpool -> BasicBlock -> global avg.

    x_ref:  (1, 4, H2, W2, C)  parity-split input, index p = 2*(h%2) + (w%2)
    w*_ref: (9, C, C) bf16     conv weights (kh*3+kw, Cin, Cout), BN-scale folded
    s1/b1/b2/b3: (1, C) f32    bn1 scale/bias, folded bn2/bn3 biases
    out_ref: (1, 1, C) f32     global-average-pooled features
    pool_scr / h1_scr: (H2+2, W2+2, C) f32 zero-padded VMEM scratch
    """
    _, _, H2, W2, C = x_ref.shape
    M = H2 * W2

    # ---------------- bn1 + relu (f32, elementwise) ---------------- #
    y = jnp.maximum(x_ref[0] * s1_ref[...] + b1_ref[...], 0.0)   # (4, H2, W2, C)
    y00, y01, y10, y11 = y[0], y[1], y[2], y[3]   # y[2a+b] = x[2i+a, 2j+b]

    # ---- maxpool 3x3 / stride 2 / pad 1 (zero pad valid post-ReLU) ---- #
    # Entirely in registers: max over rows {2i-1, 2i, 2i+1} per column parity,
    # then max over cols {2j-1, 2j, 2j+1} via a one-column shift.
    zrow = jnp.zeros((1, W2, C), jnp.float32)
    zcol = jnp.zeros((H2, 1, C), jnp.float32)
    y10_up = jnp.concatenate([zrow, y10[:H2 - 1]], axis=0)       # row 2i-1, col 2j
    y11_up = jnp.concatenate([zrow, y11[:H2 - 1]], axis=0)       # row 2i-1, col 2j+1
    rmax0 = jnp.maximum(jnp.maximum(y00, y10), y10_up)           # col 2j
    rmax1 = jnp.maximum(jnp.maximum(y01, y11), y11_up)           # col 2j+1
    rmax1_left = jnp.concatenate([zcol, rmax1[:, :W2 - 1, :]], axis=1)  # col 2j-1
    pooled = jnp.maximum(jnp.maximum(rmax0, rmax1), rmax1_left)  # (H2, W2, C)

    # Zero-padded scratch feeding conv1 (border zero, interior = pooled map).
    pool_scr[...] = jnp.zeros(pool_scr.shape, pool_scr.dtype)
    pool_scr[1:H2 + 1, 1:W2 + 1, :] = pooled

    # 3x3 "SAME" conv as 9 accumulated MXU dots against a padded scratch.
    def conv9(scr_ref, w_ref):
        acc = jnp.zeros((M, C), jnp.float32)
        for k in range(9):
            di, dj = k // 3, k % 3
            slab = scr_ref[di:di + H2, dj:dj + W2, :].reshape(M, C)
            acc = acc + jnp.dot(slab.astype(jnp.bfloat16), w_ref[k],
                                preferred_element_type=jnp.float32)
        return acc

    # -------- conv1 (3x3, p=1) + folded bn2 + relu -------- #
    h1 = jnp.maximum(conv9(pool_scr, w1_ref) + b2_ref[...], 0.0)  # (M, C) f32

    h1_scr[...] = jnp.zeros(h1_scr.shape, h1_scr.dtype)
    h1_scr[1:H2 + 1, 1:W2 + 1, :] = h1.reshape(H2, W2, C)

    # -------- conv2 (3x3, p=1) + folded bn3 + residual + relu -------- #
    h2 = jnp.maximum(conv9(h1_scr, w2_ref) + b3_ref[...]
                     + pooled.reshape(M, C), 0.0)                 # (M, C) f32

    # -------- adaptive average pool to 1x1 (global mean) -------- #
    out_ref[...] = jnp.mean(h2, axis=0, keepdims=True).reshape(1, 1, C)


# --------------------------------- forward --------------------------------- #

def image_encoder_forward(x_nchw, params):
    """x_nchw: (N, C, H, W) float32 -> (N, C, 1, 1) float32."""
    n, c, h, w = x_nchw.shape
    assert h % 2 == 0 and w % 2 == 0, "even spatial dims expected"
    h2, w2 = h // 2, w // 2

    # Layout plumbing only (single pass over the input):
    # NCHW -> NHWC -> parity split (N, 4, H/2, W/2, C), p = 2*(h%2) + (w%2).
    x_nhwc = jnp.transpose(x_nchw, (0, 2, 3, 1)).astype(jnp.float32)
    xp = x_nhwc.reshape(n, h2, 2, w2, 2, c).transpose(0, 2, 4, 1, 3, 5)
    xp = xp.reshape(n, 4, h2, w2, c)

    out = pl.pallas_call(
        _fused_encoder_kernel,
        out_shape=jax.ShapeDtypeStruct((n, 1, c), jnp.float32),
        grid_spec=pltpu.PrefetchScalarGridSpec(
            num_scalar_prefetch=0,
            grid=(n,),
            in_specs=[
                pl.BlockSpec((1, 4, h2, w2, c), lambda i: (i, 0, 0, 0, 0)),
                pl.BlockSpec((1, c), lambda i: (0, 0)),           # bn1 scale
                pl.BlockSpec((1, c), lambda i: (0, 0)),           # bn1 bias
                pl.BlockSpec((9, c, c), lambda i: (0, 0, 0)),     # conv1 (bn2 folded)
                pl.BlockSpec((1, c), lambda i: (0, 0)),           # bn2 bias
                pl.BlockSpec((9, c, c), lambda i: (0, 0, 0)),     # conv2 (bn3 folded)
                pl.BlockSpec((1, c), lambda i: (0, 0)),           # bn3 bias
            ],
            out_specs=pl.BlockSpec((1, 1, c), lambda i: (i, 0, 0)),
            scratch_shapes=[
                pltpu.VMEM((h2 + 2, w2 + 2, c), jnp.float32),     # padded pooled map
                pltpu.VMEM((h2 + 2, w2 + 2, c), jnp.float32),     # padded h1 map
            ],
        ),
        compiler_params=pltpu.CompilerParams(
            dimension_semantics=("parallel",),
            vmem_limit_bytes=32 * 1024 * 1024,
        ),
    )(xp, params["bn1_scale"], params["bn1_bias"],
      params["w1"], params["b2"], params["w2"], params["b3"])

    return out.reshape(n, c, 1, 1)


# ------------------------------ parameter init ------------------------------ #

def init_params(key, c):
    """Deterministic synthetic parameters (stand-in for the .pth checkpoint).

    Returns (kernel_params, ref_params): kernel params have BN scales folded
    into bf16 conv weights; ref params keep the unfolded f32 originals.
    """
    eps = 1e-5
    keys = jax.random.split(key, 14)

    def bn(kg, kb, km, kv):
        gamma = 1.0 + 0.1 * jax.random.normal(kg, (c,), jnp.float32)
        beta = 0.1 * jax.random.normal(kb, (c,), jnp.float32)
        mean = 0.1 * jax.random.normal(km, (c,), jnp.float32)
        var = jnp.abs(1.0 + 0.1 * jax.random.normal(kv, (c,), jnp.float32))
        scale = gamma / jnp.sqrt(var + eps)
        bias = beta - mean * scale
        return scale, bias

    s1, b1 = bn(*keys[0:4])
    s2, b2 = bn(*keys[4:8])
    s3, b3 = bn(*keys[8:12])

    def conv_w(k):
        std = (2.0 / (9 * c)) ** 0.5
        return std * jax.random.normal(k, (c, c, 3, 3), jnp.float32)  # (Cout,Cin,3,3)

    w1 = conv_w(keys[12])
    w2 = conv_w(keys[13])

    def fold(w, scale):
        # (Cout, Cin, kh, kw) -> (kh*3+kw, Cin, Cout), BN scale folded into Cout.
        wm = jnp.transpose(w, (2, 3, 1, 0)).reshape(9, c, c)
        return (wm * scale[None, None, :]).astype(jnp.bfloat16)

    kernel_params = {
        "bn1_scale": s1[None, :], "bn1_bias": b1[None, :],
        "w1": fold(w1, s2), "b2": b2[None, :],
        "w2": fold(w2, s3), "b3": b3[None, :],
    }
    ref_params = {"s1": s1, "b1": b1, "s2": s2, "b2": b2, "s3": s3, "b3": b3,
                  "w1": w1, "w2": w2}
    return kernel_params, ref_params


# ------------------------- pure-JAX reference (f32) ------------------------- #

def reference_forward(x_nchw, rp):
    x = jnp.transpose(x_nchw, (0, 2, 3, 1)).astype(jnp.float32)
    y = jnp.maximum(x * rp["s1"] + rp["b1"], 0.0)
    pooled = jax.lax.reduce_window(
        y, -jnp.inf, jax.lax.max, (1, 3, 3, 1), (1, 2, 2, 1),
        padding=((0, 0), (1, 1), (1, 1), (0, 0)))

    def conv(t, w):  # w: (Cout, Cin, 3, 3) -> HWIO
        return jax.lax.conv_general_dilated(
            t, jnp.transpose(w, (2, 3, 1, 0)), (1, 1), "SAME",
            dimension_numbers=("NHWC", "HWIO", "NHWC"))

    h1 = jnp.maximum(conv(pooled, rp["w1"]) * rp["s2"] + rp["b2"], 0.0)
    h2 = jnp.maximum(conv(h1, rp["w2"]) * rp["s3"] + rp["b3"] + pooled, 0.0)
    feat = jnp.mean(h2, axis=(1, 2))
    return feat.reshape(x.shape[0], -1, 1, 1)


# ----------------------------------- main ----------------------------------- #

if __name__ == "__main__":
    N, C, H, W = 2, 32, 16, 16   # conv stem is dropped, so x feeds bn1 directly
    root = jax.random.PRNGKey(0)
    k_x, k_p = jax.random.split(root)
    x = jax.random.normal(k_x, (N, C, H, W), jnp.float32)
    kparams, rparams = init_params(k_p, C)

    out = jax.block_until_ready(jax.jit(image_encoder_forward)(x, kparams))
    ref = jax.block_until_ready(jax.jit(reference_forward)(x, rparams))

    assert out.shape == (N, C, 1, 1), out.shape
    assert out.dtype == jnp.float32
    assert bool(jnp.all(jnp.isfinite(out)))
    # bf16 matmuls vs f32 reference -> loose tolerance.
    assert bool(jnp.allclose(out, ref, rtol=6e-2, atol=6e-2)), (
        float(jnp.max(jnp.abs(out - ref))))
    print("KERNEL_OK")
</pallas_src>

<mosaic_0001>
module attributes {stable_mosaic.version = 11 : i64} {
  func.func @_fused_encoder_kernel(%arg0: i32, %arg1: memref<1x4x8x8x32xf32, #tpu.memory_space<vmem>>, %arg2: memref<1x32xf32, #tpu.memory_space<vmem>>, %arg3: memref<1x32xf32, #tpu.memory_space<vmem>>, %arg4: memref<9x32x32xbf16, #tpu.memory_space<vmem>>, %arg5: memref<1x32xf32, #tpu.memory_space<vmem>>, %arg6: memref<9x32x32xbf16, #tpu.memory_space<vmem>>, %arg7: memref<1x32xf32, #tpu.memory_space<vmem>>, %arg8: memref<1x1x32xf32, #tpu.memory_space<vmem>>, %arg9: memref<10x10x32xf32, #tpu.memory_space<vmem>>, %arg10: memref<10x10x32xf32, #tpu.memory_space<vmem>>) attributes {dimension_semantics = [#tpu.dimension_semantics<parallel>], iteration_bounds = array<i64: 2>, scalar_prefetch = 0 : i64, scratch_operands = 2 : i64, tpu.core_type = #tpu.core_type<tc>, window_params = [{transform_indices = @transform_0, window_bounds = array<i64: 1, 4, 8, 8, 32>}, {pipeline_mode = #tpu.pipeline_mode<synchronous>, transform_indices = @transform_1, window_bounds = array<i64: 1, 32>}, {pipeline_mode = #tpu.pipeline_mode<synchronous>, transform_indices = @transform_2, window_bounds = array<i64: 1, 32>}, {pipeline_mode = #tpu.pipeline_mode<synchronous>, transform_indices = @transform_3, window_bounds = array<i64: 9, 32, 32>}, {pipeline_mode = #tpu.pipeline_mode<synchronous>, transform_indices = @transform_4, window_bounds = array<i64: 1, 32>}, {pipeline_mode = #tpu.pipeline_mode<synchronous>, transform_indices = @transform_5, window_bounds = array<i64: 9, 32, 32>}, {pipeline_mode = #tpu.pipeline_mode<synchronous>, transform_indices = @transform_6, window_bounds = array<i64: 1, 32>}, {transform_indices = @transform_7, window_bounds = array<i64: 1, 1, 32>}]} {
    %c0 = arith.constant 0 : index
    %c0_0 = arith.constant 0 : index
    %c0_1 = arith.constant 0 : index
    %c0_2 = arith.constant 0 : index
    %c0_3 = arith.constant 0 : index
    %0 = vector.load %arg1[%c0, %c0_0, %c0_1, %c0_2, %c0_3] : memref<1x4x8x8x32xf32, #tpu.memory_space<vmem>>, vector<1x4x8x8x32xf32>
    %1 = vector.shape_cast %0 : vector<1x4x8x8x32xf32> to vector<4x8x8x32xf32>
    %c0_4 = arith.constant 0 : index
    %c0_5 = arith.constant 0 : index
    %2 = vector.load %arg2[%c0_4, %c0_5] : memref<1x32xf32, #tpu.memory_space<vmem>>, vector<1x32xf32>
    %3 = vector.shape_cast %2 : vector<1x32xf32> to vector<1x1x1x32xf32>
    %4 = vector.broadcast %3 : vector<1x1x1x32xf32> to vector<4x8x8x32xf32>
    %5 = arith.mulf %1, %4 : vector<4x8x8x32xf32>
    %c0_6 = arith.constant 0 : index
    %c0_7 = arith.constant 0 : index
    %6 = vector.load %arg3[%c0_6, %c0_7] : memref<1x32xf32, #tpu.memory_space<vmem>>, vector<1x32xf32>
    %7 = vector.shape_cast %6 : vector<1x32xf32> to vector<1x1x1x32xf32>
    %8 = vector.broadcast %7 : vector<1x1x1x32xf32> to vector<4x8x8x32xf32>
    %9 = arith.addf %5, %8 : vector<4x8x8x32xf32>
    %cst = arith.constant 0.000000e+00 : f32
    %10 = vector.broadcast %cst : f32 to vector<4x8x8x32xf32>
    %11 = arith.maximumf %9, %10 : vector<4x8x8x32xf32>
    %12 = vector.extract_strided_slice %11 {offsets = [0, 0, 0, 0], sizes = [1, 8, 8, 32], strides = [1, 1, 1, 1]} : vector<4x8x8x32xf32> to vector<1x8x8x32xf32>
    %13 = vector.shape_cast %12 : vector<1x8x8x32xf32> to vector<8x8x32xf32>
    %14 = vector.extract_strided_slice %11 {offsets = [1, 0, 0, 0], sizes = [1, 8, 8, 32], strides = [1, 1, 1, 1]} : vector<4x8x8x32xf32> to vector<1x8x8x32xf32>
    %15 = vector.shape_cast %14 : vector<1x8x8x32xf32> to vector<8x8x32xf32>
    %16 = vector.extract_strided_slice %11 {offsets = [2, 0, 0, 0], sizes = [1, 8, 8, 32], strides = [1, 1, 1, 1]} : vector<4x8x8x32xf32> to vector<1x8x8x32xf32>
    %17 = vector.shape_cast %16 : vector<1x8x8x32xf32> to vector<8x8x32xf32>
    %18 = vector.extract_strided_slice %11 {offsets = [3, 0, 0, 0], sizes = [1, 8, 8, 32], strides = [1, 1, 1, 1]} : vector<4x8x8x32xf32> to vector<1x8x8x32xf32>
    %19 = vector.shape_cast %18 : vector<1x8x8x32xf32> to vector<8x8x32xf32>
    %cst_8 = arith.constant 0.000000e+00 : f32
    %20 = vector.broadcast %cst_8 : f32 to vector<1x8x32xf32>
    %cst_9 = arith.constant 0.000000e+00 : f32
    %21 = vector.broadcast %cst_9 : f32 to vector<8x1x32xf32>
    %22 = vector.extract_strided_slice %17 {offsets = [0, 0, 0], sizes = [7, 8, 32], strides = [1, 1, 1]} : vector<8x8x32xf32> to vector<7x8x32xf32>
    %23 = tpu.concatenate %20, %22 in 0 : vector<1x8x32xf32>, vector<7x8x32xf32> -> vector<8x8x32xf32>
    %24 = vector.extract_strided_slice %19 {offsets = [0, 0, 0], sizes = [7, 8, 32], strides = [1, 1, 1]} : vector<8x8x32xf32> to vector<7x8x32xf32>
    %25 = tpu.concatenate %20, %24 in 0 : vector<1x8x32xf32>, vector<7x8x32xf32> -> vector<8x8x32xf32>
    %26 = arith.maximumf %13, %17 : vector<8x8x32xf32>
    %27 = arith.maximumf %26, %23 : vector<8x8x32xf32>
    %28 = arith.maximumf %15, %19 : vector<8x8x32xf32>
    %29 = arith.maximumf %28, %25 : vector<8x8x32xf32>
    %30 = vector.extract_strided_slice %29 {offsets = [0, 0, 0], sizes = [8, 7, 32], strides = [1, 1, 1]} : vector<8x8x32xf32> to vector<8x7x32xf32>
    %31 = tpu.concatenate %21, %30 in 1 : vector<8x1x32xf32>, vector<8x7x32xf32> -> vector<8x8x32xf32>
    %32 = arith.maximumf %27, %29 : vector<8x8x32xf32>
    %33 = arith.maximumf %32, %31 : vector<8x8x32xf32>
    %cst_10 = arith.constant 0.000000e+00 : f32
    %34 = vector.broadcast %cst_10 : f32 to vector<10x10x32xf32>
    %c0_11 = arith.constant 0 : index
    %c0_12 = arith.constant 0 : index
    %c0_13 = arith.constant 0 : index
    %35 = vector.load %arg9[%c0_11, %c0_12, %c0_13] : memref<10x10x32xf32, #tpu.memory_space<vmem>>, vector<10x10x32xf32>
    tpu.vector_store %arg9[%c0_11, %c0_12, %c0_13], %34 {strides = array<i32>} : memref<10x10x32xf32, #tpu.memory_space<vmem>>, vector<10x10x32xf32>,
    %c1 = arith.constant 1 : index
    %c1_14 = arith.constant 1 : index
    %c0_15 = arith.constant 0 : index
    %36 = vector.load %arg9[%c1, %c1_14, %c0_15] : memref<10x10x32xf32, #tpu.memory_space<vmem>>, vector<8x8x32xf32>
    tpu.vector_store %arg9[%c1, %c1_14, %c0_15], %33 {strides = array<i32>} : memref<10x10x32xf32, #tpu.memory_space<vmem>>, vector<8x8x32xf32>,
    %cst_16 = arith.constant 0.000000e+00 : f32
    %37 = vector.broadcast %cst_16 : f32 to vector<64x32xf32>
    %c0_17 = arith.constant 0 : index
    %c0_18 = arith.constant 0 : index
    %c0_19 = arith.constant 0 : index
    %38 = vector.load %arg9[%c0_17, %c0_18, %c0_19] : memref<10x10x32xf32, #tpu.memory_space<vmem>>, vector<8x8x32xf32>
    %39 = vector.shape_cast %38 : vector<8x8x32xf32> to vector<64x32xf32>
    %40 = arith.truncf %39 : vector<64x32xf32> to vector<64x32xbf16>
    %c0_20 = arith.constant 0 : index
    %c0_21 = arith.constant 0 : index
    %c0_22 = arith.constant 0 : index
    %41 = vector.load %arg4[%c0_20, %c0_21, %c0_22] : memref<9x32x32xbf16, #tpu.memory_space<vmem>>, vector<1x32x32xbf16>
    %42 = vector.shape_cast %41 : vector<1x32x32xbf16> to vector<32x32xbf16>
    %cst_23 = arith.constant dense<0.000000e+00> : vector<64x32xf32>
    %43 = tpu.matmul %40, %42, %cst_23 {dimension_numbers = #tpu.dot_dimension_numbers<[1], [0], [0], [1], [0, 0, 1, 1], [], []>} : vector<64x32xbf16>, vector<32x32xbf16>, vector<64x32xf32> -> vector<64x32xf32>
    %44 = arith.addf %37, %43 : vector<64x32xf32>
    %c0_24 = arith.constant 0 : index
    %c1_25 = arith.constant 1 : index
    %c0_26 = arith.constant 0 : index
    %45 = vector.load %arg9[%c0_24, %c1_25, %c0_26] : memref<10x10x32xf32, #tpu.memory_space<vmem>>, vector<8x8x32xf32>
    %46 = vector.shape_cast %45 : vector<8x8x32xf32> to vector<64x32xf32>
    %47 = arith.truncf %46 : vector<64x32xf32> to vector<64x32xbf16>
    %c1_27 = arith.constant 1 : index
    %c0_28 = arith.constant 0 : index
    %c0_29 = arith.constant 0 : index
    %48 = vector.load %arg4[%c1_27, %c0_28, %c0_29] : memref<9x32x32xbf16, #tpu.memory_space<vmem>>, vector<1x32x32xbf16>
    %49 = vector.shape_cast %48 : vector<1x32x32xbf16> to vector<32x32xbf16>
    %cst_30 = arith.constant dense<0.000000e+00> : vector<64x32xf32>
    %50 = tpu.matmul %47, %49, %cst_30 {dimension_numbers = #tpu.dot_dimension_numbers<[1], [0], [0], [1], [0, 0, 1, 1], [], []>} : vector<64x32xbf16>, vector<32x32xbf16>, vector<64x32xf32> -> vector<64x32xf32>
    %51 = arith.addf %44, %50 : vector<64x32xf32>
    %c0_31 = arith.constant 0 : index
    %c2 = arith.constant 2 : index
    %c0_32 = arith.constant 0 : index
    %52 = vector.load %arg9[%c0_31, %c2, %c0_32] : memref<10x10x32xf32, #tpu.memory_space<vmem>>, vector<8x8x32xf32>
    %53 = vector.shape_cast %52 : vector<8x8x32xf32> to vector<64x32xf32>
    %54 = arith.truncf %53 : vector<64x32xf32> to vector<64x32xbf16>
    %c2_33 = arith.constant 2 : index
    %c0_34 = arith.constant 0 : index
    %c0_35 = arith.constant 0 : index
    %55 = vector.load %arg4[%c2_33, %c0_34, %c0_35] : memref<9x32x32xbf16, #tpu.memory_space<vmem>>, vector<1x32x32xbf16>
    %56 = vector.shape_cast %55 : vector<1x32x32xbf16> to vector<32x32xbf16>
    %cst_36 = arith.constant dense<0.000000e+00> : vector<64x32xf32>
    %57 = tpu.matmul %54, %56, %cst_36 {dimension_numbers = #tpu.dot_dimension_numbers<[1], [0], [0], [1], [0, 0, 1, 1], [], []>} : vector<64x32xbf16>, vector<32x32xbf16>, vector<64x32xf32> -> vector<64x32xf32>
    %58 = arith.addf %51, %57 : vector<64x32xf32>
    %c1_37 = arith.constant 1 : index
    %c0_38 = arith.constant 0 : index
    %c0_39 = arith.constant 0 : index
    %59 = vector.load %arg9[%c1_37, %c0_38, %c0_39] : memref<10x10x32xf32, #tpu.memory_space<vmem>>, vector<8x8x32xf32>
    %60 = vector.shape_cast %59 : vector<8x8x32xf32> to vector<64x32xf32>
    %61 = arith.truncf %60 : vector<64x32xf32> to vector<64x32xbf16>
    %c3 = arith.constant 3 : index
    %c0_40 = arith.constant 0 : index
    %c0_41 = arith.constant 0 : index
    %62 = vector.load %arg4[%c3, %c0_40, %c0_41] : memref<9x32x32xbf16, #tpu.memory_space<vmem>>, vector<1x32x32xbf16>
    %63 = vector.shape_cast %62 : vector<1x32x32xbf16> to vector<32x32xbf16>
    %cst_42 = arith.constant dense<0.000000e+00> : vector<64x32xf32>
    %64 = tpu.matmul %61, %63, %cst_42 {dimension_numbers = #tpu.dot_dimension_numbers<[1], [0], [0], [1], [0, 0, 1, 1], [], []>} : vector<64x32xbf16>, vector<32x32xbf16>, vector<64x32xf32> -> vector<64x32xf32>
    %65 = arith.addf %58, %64 : vector<64x32xf32>
    %c1_43 = arith.constant 1 : index
    %c1_44 = arith.constant 1 : index
    %c0_45 = arith.constant 0 : index
    %66 = vector.load %arg9[%c1_43, %c1_44, %c0_45] : memref<10x10x32xf32, #tpu.memory_space<vmem>>, vector<8x8x32xf32>
    %67 = vector.shape_cast %66 : vector<8x8x32xf32> to vector<64x32xf32>
    %68 = arith.truncf %67 : vector<64x32xf32> to vector<64x32xbf16>
    %c4 = arith.constant 4 : index
    %c0_46 = arith.constant 0 : index
    %c0_47 = arith.constant 0 : index
    %69 = vector.load %arg4[%c4, %c0_46, %c0_47] : memref<9x32x32xbf16, #tpu.memory_space<vmem>>, vector<1x32x32xbf16>
    %70 = vector.shape_cast %69 : vector<1x32x32xbf16> to vector<32x32xbf16>
    %cst_48 = arith.constant dense<0.000000e+00> : vector<64x32xf32>
    %71 = tpu.matmul %68, %70, %cst_48 {dimension_numbers = #tpu.dot_dimension_numbers<[1], [0], [0], [1], [0, 0, 1, 1], [], []>} : vector<64x32xbf16>, vector<32x32xbf16>, vector<64x32xf32> -> vector<64x32xf32>
    %72 = arith.addf %65, %71 : vector<64x32xf32>
    %c1_49 = arith.constant 1 : index
    %c2_50 = arith.constant 2 : index
    %c0_51 = arith.constant 0 : index
    %73 = vector.load %arg9[%c1_49, %c2_50, %c0_51] : memref<10x10x32xf32, #tpu.memory_space<vmem>>, vector<8x8x32xf32>
    %74 = vector.shape_cast %73 : vector<8x8x32xf32> to vector<64x32xf32>
    %75 = arith.truncf %74 : vector<64x32xf32> to vector<64x32xbf16>
    %c5 = arith.constant 5 : index
    %c0_52 = arith.constant 0 : index
    %c0_53 = arith.constant 0 : index
    %76 = vector.load %arg4[%c5, %c0_52, %c0_53] : memref<9x32x32xbf16, #tpu.memory_space<vmem>>, vector<1x32x32xbf16>
    %77 = vector.shape_cast %76 : vector<1x32x32xbf16> to vector<32x32xbf16>
    %cst_54 = arith.constant dense<0.000000e+00> : vector<64x32xf32>
    %78 = tpu.matmul %75, %77, %cst_54 {dimension_numbers = #tpu.dot_dimension_numbers<[1], [0], [0], [1], [0, 0, 1, 1], [], []>} : vector<64x32xbf16>, vector<32x32xbf16>, vector<64x32xf32> -> vector<64x32xf32>
    %79 = arith.addf %72, %78 : vector<64x32xf32>
    %c2_55 = arith.constant 2 : index
    %c0_56 = arith.constant 0 : index
    %c0_57 = arith.constant 0 : index
    %80 = vector.load %arg9[%c2_55, %c0_56, %c0_57] : memref<10x10x32xf32, #tpu.memory_space<vmem>>, vector<8x8x32xf32>
    %81 = vector.shape_cast %80 : vector<8x8x32xf32> to vector<64x32xf32>
    %82 = arith.truncf %81 : vector<64x32xf32> to vector<64x32xbf16>
    %c6 = arith.constant 6 : index
    %c0_58 = arith.constant 0 : index
    %c0_59 = arith.constant 0 : index
    %83 = vector.load %arg4[%c6, %c0_58, %c0_59] : memref<9x32x32xbf16, #tpu.memory_space<vmem>>, vector<1x32x32xbf16>
    %84 = vector.shape_cast %83 : vector<1x32x32xbf16> to vector<32x32xbf16>
    %cst_60 = arith.constant dense<0.000000e+00> : vector<64x32xf32>
    %85 = tpu.matmul %82, %84, %cst_60 {dimension_numbers = #tpu.dot_dimension_numbers<[1], [0], [0], [1], [0, 0, 1, 1], [], []>} : vector<64x32xbf16>, vector<32x32xbf16>, vector<64x32xf32> -> vector<64x32xf32>
    %86 = arith.addf %79, %85 : vector<64x32xf32>
    %c2_61 = arith.constant 2 : index
    %c1_62 = arith.constant 1 : index
    %c0_63 = arith.constant 0 : index
    %87 = vector.load %arg9[%c2_61, %c1_62, %c0_63] : memref<10x10x32xf32, #tpu.memory_space<vmem>>, vector<8x8x32xf32>
    %88 = vector.shape_cast %87 : vector<8x8x32xf32> to vector<64x32xf32>
    %89 = arith.truncf %88 : vector<64x32xf32> to vector<64x32xbf16>
    %c7 = arith.constant 7 : index
    %c0_64 = arith.constant 0 : index
    %c0_65 = arith.constant 0 : index
    %90 = vector.load %arg4[%c7, %c0_64, %c0_65] : memref<9x32x32xbf16, #tpu.memory_space<vmem>>, vector<1x32x32xbf16>
    %91 = vector.shape_cast %90 : vector<1x32x32xbf16> to vector<32x32xbf16>
    %cst_66 = arith.constant dense<0.000000e+00> : vector<64x32xf32>
    %92 = tpu.matmul %89, %91, %cst_66 {dimension_numbers = #tpu.dot_dimension_numbers<[1], [0], [0], [1], [0, 0, 1, 1], [], []>} : vector<64x32xbf16>, vector<32x32xbf16>, vector<64x32xf32> -> vector<64x32xf32>
    %93 = arith.addf %86, %92 : vector<64x32xf32>
    %c2_67 = arith.constant 2 : index
    %c2_68 = arith.constant 2 : index
    %c0_69 = arith.constant 0 : index
    %94 = vector.load %arg9[%c2_67, %c2_68, %c0_69] : memref<10x10x32xf32, #tpu.memory_space<vmem>>, vector<8x8x32xf32>
    %95 = vector.shape_cast %94 : vector<8x8x32xf32> to vector<64x32xf32>
    %96 = arith.truncf %95 : vector<64x32xf32> to vector<64x32xbf16>
    %c8 = arith.constant 8 : index
    %c0_70 = arith.constant 0 : index
    %c0_71 = arith.constant 0 : index
    %97 = vector.load %arg4[%c8, %c0_70, %c0_71] : memref<9x32x32xbf16, #tpu.memory_space<vmem>>, vector<1x32x32xbf16>
    %98 = vector.shape_cast %97 : vector<1x32x32xbf16> to vector<32x32xbf16>
    %cst_72 = arith.constant dense<0.000000e+00> : vector<64x32xf32>
    %99 = tpu.matmul %96, %98, %cst_72 {dimension_numbers = #tpu.dot_dimension_numbers<[1], [0], [0], [1], [0, 0, 1, 1], [], []>} : vector<64x32xbf16>, vector<32x32xbf16>, vector<64x32xf32> -> vector<64x32xf32>
    %100 = arith.addf %93, %99 : vector<64x32xf32>
    %c0_73 = arith.constant 0 : index
    %c0_74 = arith.constant 0 : index
    %101 = vector.load %arg5[%c0_73, %c0_74] : memref<1x32xf32, #tpu.memory_space<vmem>>, vector<1x32xf32>
    %102 = vector.broadcast %101 : vector<1x32xf32> to vector<64x32xf32>
    %103 = arith.addf %100, %102 : vector<64x32xf32>
    %cst_75 = arith.constant 0.000000e+00 : f32
    %104 = vector.broadcast %cst_75 : f32 to vector<64x32xf32>
    %105 = arith.maximumf %103, %104 : vector<64x32xf32>
    %cst_76 = arith.constant 0.000000e+00 : f32
    %106 = vector.broadcast %cst_76 : f32 to vector<10x10x32xf32>
    %c0_77 = arith.constant 0 : index
    %c0_78 = arith.constant 0 : index
    %c0_79 = arith.constant 0 : index
    %107 = vector.load %arg10[%c0_77, %c0_78, %c0_79] : memref<10x10x32xf32, #tpu.memory_space<vmem>>, vector<10x10x32xf32>
    tpu.vector_store %arg10[%c0_77, %c0_78, %c0_79], %106 {strides = array<i32>} : memref<10x10x32xf32, #tpu.memory_space<vmem>>, vector<10x10x32xf32>,
    %108 = vector.shape_cast %105 : vector<64x32xf32> to vector<8x8x32xf32>
    %c1_80 = arith.constant 1 : index
    %c1_81 = arith.constant 1 : index
    %c0_82 = arith.constant 0 : index
    %109 = vector.load %arg10[%c1_80, %c1_81, %c0_82] : memref<10x10x32xf32, #tpu.memory_space<vmem>>, vector<8x8x32xf32>
    tpu.vector_store %arg10[%c1_80, %c1_81, %c0_82], %108 {strides = array<i32>} : memref<10x10x32xf32, #tpu.memory_space<vmem>>, vector<8x8x32xf32>,
    %cst_83 = arith.constant 0.000000e+00 : f32
    %110 = vector.broadcast %cst_83 : f32 to vector<64x32xf32>
    %c0_84 = arith.constant 0 : index
    %c0_85 = arith.constant 0 : index
    %c0_86 = arith.constant 0 : index
    %111 = vector.load %arg10[%c0_84, %c0_85, %c0_86] : memref<10x10x32xf32, #tpu.memory_space<vmem>>, vector<8x8x32xf32>
    %112 = vector.shape_cast %111 : vector<8x8x32xf32> to vector<64x32xf32>
    %113 = arith.truncf %112 : vector<64x32xf32> to vector<64x32xbf16>
    %c0_87 = arith.constant 0 : index
    %c0_88 = arith.constant 0 : index
    %c0_89 = arith.constant 0 : index
    %114 = vector.load %arg6[%c0_87, %c0_88, %c0_89] : memref<9x32x32xbf16, #tpu.memory_space<vmem>>, vector<1x32x32xbf16>
    %115 = vector.shape_cast %114 : vector<1x32x32xbf16> to vector<32x32xbf16>
    %cst_90 = arith.constant dense<0.000000e+00> : vector<64x32xf32>
    %116 = tpu.matmul %113, %115, %cst_90 {dimension_numbers = #tpu.dot_dimension_numbers<[1], [0], [0], [1], [0, 0, 1, 1], [], []>} : vector<64x32xbf16>, vector<32x32xbf16>, vector<64x32xf32> -> vector<64x32xf32>
    %117 = arith.addf %110, %116 : vector<64x32xf32>
    %c0_91 = arith.constant 0 : index
    %c1_92 = arith.constant 1 : index
    %c0_93 = arith.constant 0 : index
    %118 = vector.load %arg10[%c0_91, %c1_92, %c0_93] : memref<10x10x32xf32, #tpu.memory_space<vmem>>, vector<8x8x32xf32>
    %119 = vector.shape_cast %118 : vector<8x8x32xf32> to vector<64x32xf32>
    %120 = arith.truncf %119 : vector<64x32xf32> to vector<64x32xbf16>
    %c1_94 = arith.constant 1 : index
    %c0_95 = arith.constant 0 : index
    %c0_96 = arith.constant 0 : index
    %121 = vector.load %arg6[%c1_94, %c0_95, %c0_96] : memref<9x32x32xbf16, #tpu.memory_space<vmem>>, vector<1x32x32xbf16>
    %122 = vector.shape_cast %121 : vector<1x32x32xbf16> to vector<32x32xbf16>
    %cst_97 = arith.constant dense<0.000000e+00> : vector<64x32xf32>
    %123 = tpu.matmul %120, %122, %cst_97 {dimension_numbers = #tpu.dot_dimension_numbers<[1], [0], [0], [1], [0, 0, 1, 1], [], []>} : vector<64x32xbf16>, vector<32x32xbf16>, vector<64x32xf32> -> vector<64x32xf32>
    %124 = arith.addf %117, %123 : vector<64x32xf32>
    %c0_98 = arith.constant 0 : index
    %c2_99 = arith.constant 2 : index
    %c0_100 = arith.constant 0 : index
    %125 = vector.load %arg10[%c0_98, %c2_99, %c0_100] : memref<10x10x32xf32, #tpu.memory_space<vmem>>, vector<8x8x32xf32>
    %126 = vector.shape_cast %125 : vector<8x8x32xf32> to vector<64x32xf32>
    %127 = arith.truncf %126 : vector<64x32xf32> to vector<64x32xbf16>
    %c2_101 = arith.constant 2 : index
    %c0_102 = arith.constant 0 : index
    %c0_103 = arith.constant 0 : index
    %128 = vector.load %arg6[%c2_101, %c0_102, %c0_103] : memref<9x32x32xbf16, #tpu.memory_space<vmem>>, vector<1x32x32xbf16>
    %129 = vector.shape_cast %128 : vector<1x32x32xbf16> to vector<32x32xbf16>
    %cst_104 = arith.constant dense<0.000000e+00> : vector<64x32xf32>
    %130 = tpu.matmul %127, %129, %cst_104 {dimension_numbers = #tpu.dot_dimension_numbers<[1], [0], [0], [1], [0, 0, 1, 1], [], []>} : vector<64x32xbf16>, vector<32x32xbf16>, vector<64x32xf32> -> vector<64x32xf32>
    %131 = arith.addf %124, %130 : vector<64x32xf32>
    %c1_105 = arith.constant 1 : index
    %c0_106 = arith.constant 0 : index
    %c0_107 = arith.constant 0 : index
    %132 = vector.load %arg10[%c1_105, %c0_106, %c0_107] : memref<10x10x32xf32, #tpu.memory_space<vmem>>, vector<8x8x32xf32>
    %133 = vector.shape_cast %132 : vector<8x8x32xf32> to vector<64x32xf32>
    %134 = arith.truncf %133 : vector<64x32xf32> to vector<64x32xbf16>
    %c3_108 = arith.constant 3 : index
    %c0_109 = arith.constant 0 : index
    %c0_110 = arith.constant 0 : index
    %135 = vector.load %arg6[%c3_108, %c0_109, %c0_110] : memref<9x32x32xbf16, #tpu.memory_space<vmem>>, vector<1x32x32xbf16>
    %136 = vector.shape_cast %135 : vector<1x32x32xbf16> to vector<32x32xbf16>
    %cst_111 = arith.constant dense<0.000000e+00> : vector<64x32xf32>
    %137 = tpu.matmul %134, %136, %cst_111 {dimension_numbers = #tpu.dot_dimension_numbers<[1], [0], [0], [1], [0, 0, 1, 1], [], []>} : vector<64x32xbf16>, vector<32x32xbf16>, vector<64x32xf32> -> vector<64x32xf32>
    %138 = arith.addf %131, %137 : vector<64x32xf32>
    %c1_112 = arith.constant 1 : index
    %c1_113 = arith.constant 1 : index
    %c0_114 = arith.constant 0 : index
    %139 = vector.load %arg10[%c1_112, %c1_113, %c0_114] : memref<10x10x32xf32, #tpu.memory_space<vmem>>, vector<8x8x32xf32>
    %140 = vector.shape_cast %139 : vector<8x8x32xf32> to vector<64x32xf32>
    %141 = arith.truncf %140 : vector<64x32xf32> to vector<64x32xbf16>
    %c4_115 = arith.constant 4 : index
    %c0_116 = arith.constant 0 : index
    %c0_117 = arith.constant 0 : index
    %142 = vector.load %arg6[%c4_115, %c0_116, %c0_117] : memref<9x32x32xbf16, #tpu.memory_space<vmem>>, vector<1x32x32xbf16>
    %143 = vector.shape_cast %142 : vector<1x32x32xbf16> to vector<32x32xbf16>
    %cst_118 = arith.constant dense<0.000000e+00> : vector<64x32xf32>
    %144 = tpu.matmul %141, %143, %cst_118 {dimension_numbers = #tpu.dot_dimension_numbers<[1], [0], [0], [1], [0, 0, 1, 1], [], []>} : vector<64x32xbf16>, vector<32x32xbf16>, vector<64x32xf32> -> vector<64x32xf32>
    %145 = arith.addf %138, %144 : vector<64x32xf32>
    %c1_119 = arith.constant 1 : index
    %c2_120 = arith.constant 2 : index
    %c0_121 = arith.constant 0 : index
    %146 = vector.load %arg10[%c1_119, %c2_120, %c0_121] : memref<10x10x32xf32, #tpu.memory_space<vmem>>, vector<8x8x32xf32>
    %147 = vector.shape_cast %146 : vector<8x8x32xf32> to vector<64x32xf32>
    %148 = arith.truncf %147 : vector<64x32xf32> to vector<64x32xbf16>
    %c5_122 = arith.constant 5 : index
    %c0_123 = arith.constant 0 : index
    %c0_124 = arith.constant 0 : index
    %149 = vector.load %arg6[%c5_122, %c0_123, %c0_124] : memref<9x32x32xbf16, #tpu.memory_space<vmem>>, vector<1x32x32xbf16>
    %150 = vector.shape_cast %149 : vector<1x32x32xbf16> to vector<32x32xbf16>
    %cst_125 = arith.constant dense<0.000000e+00> : vector<64x32xf32>
    %151 = tpu.matmul %148, %150, %cst_125 {dimension_numbers = #tpu.dot_dimension_numbers<[1], [0], [0], [1], [0, 0, 1, 1], [], []>} : vector<64x32xbf16>, vector<32x32xbf16>, vector<64x32xf32> -> vector<64x32xf32>
    %152 = arith.addf %145, %151 : vector<64x32xf32>
    %c2_126 = arith.constant 2 : index
    %c0_127 = arith.constant 0 : index
    %c0_128 = arith.constant 0 : index
    %153 = vector.load %arg10[%c2_126, %c0_127, %c0_128] : memref<10x10x32xf32, #tpu.memory_space<vmem>>, vector<8x8x32xf32>
    %154 = vector.shape_cast %153 : vector<8x8x32xf32> to vector<64x32xf32>
    %155 = arith.truncf %154 : vector<64x32xf32> to vector<64x32xbf16>
    %c6_129 = arith.constant 6 : index
    %c0_130 = arith.constant 0 : index
    %c0_131 = arith.constant 0 : index
    %156 = vector.load %arg6[%c6_129, %c0_130, %c0_131] : memref<9x32x32xbf16, #tpu.memory_space<vmem>>, vector<1x32x32xbf16>
    %157 = vector.shape_cast %156 : vector<1x32x32xbf16> to vector<32x32xbf16>
    %cst_132 = arith.constant dense<0.000000e+00> : vector<64x32xf32>
    %158 = tpu.matmul %155, %157, %cst_132 {dimension_numbers = #tpu.dot_dimension_numbers<[1], [0], [0], [1], [0, 0, 1, 1], [], []>} : vector<64x32xbf16>, vector<32x32xbf16>, vector<64x32xf32> -> vector<64x32xf32>
    %159 = arith.addf %152, %158 : vector<64x32xf32>
    %c2_133 = arith.constant 2 : index
    %c1_134 = arith.constant 1 : index
    %c0_135 = arith.constant 0 : index
    %160 = vector.load %arg10[%c2_133, %c1_134, %c0_135] : memref<10x10x32xf32, #tpu.memory_space<vmem>>, vector<8x8x32xf32>
    %161 = vector.shape_cast %160 : vector<8x8x32xf32> to vector<64x32xf32>
    %162 = arith.truncf %161 : vector<64x32xf32> to vector<64x32xbf16>
    %c7_136 = arith.constant 7 : index
    %c0_137 = arith.constant 0 : index
    %c0_138 = arith.constant 0 : index
    %163 = vector.load %arg6[%c7_136, %c0_137, %c0_138] : memref<9x32x32xbf16, #tpu.memory_space<vmem>>, vector<1x32x32xbf16>
    %164 = vector.shape_cast %163 : vector<1x32x32xbf16> to vector<32x32xbf16>
    %cst_139 = arith.constant dense<0.000000e+00> : vector<64x32xf32>
    %165 = tpu.matmul %162, %164, %cst_139 {dimension_numbers = #tpu.dot_dimension_numbers<[1], [0], [0], [1], [0, 0, 1, 1], [], []>} : vector<64x32xbf16>, vector<32x32xbf16>, vector<64x32xf32> -> vector<64x32xf32>
    %166 = arith.addf %159, %165 : vector<64x32xf32>
    %c2_140 = arith.constant 2 : index
    %c2_141 = arith.constant 2 : index
    %c0_142 = arith.constant 0 : index
    %167 = vector.load %arg10[%c2_140, %c2_141, %c0_142] : memref<10x10x32xf32, #tpu.memory_space<vmem>>, vector<8x8x32xf32>
    %168 = vector.shape_cast %167 : vector<8x8x32xf32> to vector<64x32xf32>
    %169 = arith.truncf %168 : vector<64x32xf32> to vector<64x32xbf16>
    %c8_143 = arith.constant 8 : index
    %c0_144 = arith.constant 0 : index
    %c0_145 = arith.constant 0 : index
    %170 = vector.load %arg6[%c8_143, %c0_144, %c0_145] : memref<9x32x32xbf16, #tpu.memory_space<vmem>>, vector<1x32x32xbf16>
    %171 = vector.shape_cast %170 : vector<1x32x32xbf16> to vector<32x32xbf16>
    %cst_146 = arith.constant dense<0.000000e+00> : vector<64x32xf32>
    %172 = tpu.matmul %169, %171, %cst_146 {dimension_numbers = #tpu.dot_dimension_numbers<[1], [0], [0], [1], [0, 0, 1, 1], [], []>} : vector<64x32xbf16>, vector<32x32xbf16>, vector<64x32xf32> -> vector<64x32xf32>
    %173 = arith.addf %166, %172 : vector<64x32xf32>
    %c0_147 = arith.constant 0 : index
    %c0_148 = arith.constant 0 : index
    %174 = vector.load %arg7[%c0_147, %c0_148] : memref<1x32xf32, #tpu.memory_space<vmem>>, vector<1x32xf32>
    %175 = vector.broadcast %174 : vector<1x32xf32> to vector<64x32xf32>
    %176 = arith.addf %173, %175 : vector<64x32xf32>
    %177 = vector.shape_cast %33 : vector<8x8x32xf32> to vector<64x32xf32>
    %178 = arith.addf %176, %177 : vector<64x32xf32>
    %cst_149 = arith.constant 0.000000e+00 : f32
    %179 = vector.broadcast %cst_149 : f32 to vector<64x32xf32>
    %180 = arith.maximumf %178, %179 : vector<64x32xf32>
    %cst_150 = arith.constant dense<0.000000e+00> : vector<32xf32>
    %181 = vector.multi_reduction <add>, %180, %cst_150 [0] : vector<64x32xf32> to vector<32xf32>
    %182 = vector.shape_cast %181 : vector<32xf32> to vector<1x32xf32>
    %cst_151 = arith.constant 6.400000e+01 : f32
    %183 = vector.broadcast %cst_151 : f32 to vector<1x32xf32>
    %184 = arith.divf %182, %183 : vector<1x32xf32>
    %185 = vector.shape_cast %184 : vector<1x32xf32> to vector<1x1x32xf32>
    %c0_152 = arith.constant 0 : index
    %c0_153 = arith.constant 0 : index
    %c0_154 = arith.constant 0 : index
    %186 = vector.load %arg8[%c0_152, %c0_153, %c0_154] : memref<1x1x32xf32, #tpu.memory_space<vmem>>, vector<1x1x32xf32>
    tpu.vector_store %arg8[%c0_152, %c0_153, %c0_154], %185 {strides = array<i32>} : memref<1x1x32xf32, #tpu.memory_space<vmem>>, vector<1x1x32xf32>,
    return
  }
  func.func @transform_0(%arg0: i32) -> (i32, i32, i32, i32, i32) {
    %c0_i32 = arith.constant 0 : i32
    %c0_i32_0 = arith.constant 0 : i32
    %c0_i32_1 = arith.constant 0 : i32
    %c0_i32_2 = arith.constant 0 : i32
    %c0_i32_3 = arith.constant 0 : i32
    return %arg0, %c0_i32, %c0_i32_0, %c0_i32_1, %c0_i32_2 : i32, i32, i32, i32, i32
  }
  func.func @transform_1(%arg0: i32) -> (i32, i32) {
    %c0_i32 = arith.constant 0 : i32
    %c0_i32_0 = arith.constant 0 : i32
    %c0_i32_1 = arith.constant 0 : i32
    return %c0_i32, %c0_i32_0 : i32, i32
  }
  func.func @transform_2(%arg0: i32) -> (i32, i32) {
    %c0_i32 = arith.constant 0 : i32
    %c0_i32_0 = arith.constant 0 : i32
    %c0_i32_1 = arith.constant 0 : i32
    return %c0_i32, %c0_i32_0 : i32, i32
  }
  func.func @transform_3(%arg0: i32) -> (i32, i32, i32) {
    %c0_i32 = arith.constant 0 : i32
    %c0_i32_0 = arith.constant 0 : i32
    %c0_i32_1 = arith.constant 0 : i32
    %c0_i32_2 = arith.constant 0 : i32
    return %c0_i32, %c0_i32_0, %c0_i32_1 : i32, i32, i32
  }
  func.func @transform_4(%arg0: i32) -> (i32, i32) {
    %c0_i32 = arith.constant 0 : i32
    %c0_i32_0 = arith.constant 0 : i32
    %c0_i32_1 = arith.constant 0 : i32
    return %c0_i32, %c0_i32_0 : i32, i32
  }
  func.func @transform_5(%arg0: i32) -> (i32, i32, i32) {
    %c0_i32 = arith.constant 0 : i32
    %c0_i32_0 = arith.constant 0 : i32
    %c0_i32_1 = arith.constant 0 : i32
    %c0_i32_2 = arith.constant 0 : i32
    return %c0_i32, %c0_i32_0, %c0_i32_1 : i32, i32, i32
  }
  func.func @transform_6(%arg0: i32) -> (i32, i32) {
    %c0_i32 = arith.constant 0 : i32
    %c0_i32_0 = arith.constant 0 : i32
    %c0_i32_1 = arith.constant 0 : i32
    return %c0_i32, %c0_i32_0 : i32, i32
  }
  func.func @transform_7(%arg0: i32) -> (i32, i32, i32) {
    %c0_i32 = arith.constant 0 : i32
    %c0_i32_0 = arith.constant 0 : i32
    %c0_i32_1 = arith.constant 0 : i32
    return %arg0, %c0_i32, %c0_i32_0 : i32, i32, i32
  }
}

</mosaic_0001>

<bundles_post_ra>
// kernel: image_encoder_forward.1
= control target key start
LH: loop header
LB: loop body
LE: loop exit
PB: predicated region body
PF: predicated region fallthrough
CT: control target
= control target key end

     0   :  { %12 = vsyncpa [#allocation5], 0  ;;  %s4226_s0 = inlined_call_operand.vmem [shape: f32[2,4,8,8,32], index: 0, kind: input, shape index: {}]   ;;  %s4227_s1 = inlined_call_operand.vmem [shape: f32[1,32], index: 1, kind: input, shape index: {}]   ;;  %s4228_s2 = inlined_call_operand.vmem [shape: f32[1,32], index: 2, kind: input, shape index: {}]   ;;  %s4229_s3 = inlined_call_operand.vmem [shape: bf16[9,32,32], index: 3, kind: input, shape index: {}]   ;;  %s4230_s4 = inlined_call_operand.vmem [shape: f32[1,32], index: 4, kind: input, shape index: {}]   ;;  %s4231_s5 = inlined_call_operand.vmem [shape: bf16[9,32,32], index: 5, kind: input, shape index: {}]   ;;  %s4232_s6 = inlined_call_operand.vmem [shape: f32[1,32], index: 6, kind: input, shape index: {}]   ;;  %s4233_s7 = inlined_call_operand.hbm [shape: f32[2,1,32], index: 7, kind: output, shape index: {}]  }
   0x1   :  { %14 = vsyncpa [#allocation5 + $0x1], 0  ;;  %s3547_s24 = smov 0   ;;  %s3549_s25 = smov 0  }
   0x2   :  { %s3551_s26 = smov 0   ;;  %s3553_s27 = smov 0  }
   0x3 LB: > { %s3568_s28 = sadd.s32 4294967295, %s3503_s27   ;;  %s2727_s29 = sadd.s32 4294967294, %s3503_s27   ;;  %s3503_s27 = sphi %s3553_s27, %s4239_s27   ;;  %s3499_s26 = sphi %s3551_s26, %s4238_s26   ;;  %s3495_s25 = sphi %s3549_s25, %s4237_s25   ;;  %s3491_s24 = sphi %s3547_s24, %s4236_s24  }
   0x4   : > { %s3572_s30 = sadd.s32 1, %s3503_s27   ;;  %s179_s8 = sadd.s32 1, %s3499_s26 }
   0x5   : > { %s176_s9 = ssub.s32 %s3503_s27, %s3572_s30  ;;  %p189_p0 = scmp.ne.s32.totalorder %s3499_s26, %s3495_s25 }
   0x6   : > { %p177_p1 = scmp.eq.s32.totalorder %s176_s9, 0  ;;  %p190_p2 = scmp.eq.s32.totalorder %s3568_s28, 1 }
   0x7   : > { %p195_p3 = scmp.ne.s32.totalorder %s3495_s25, %s3491_s24  ;;  %p196_p4 = scmp.eq.s32.totalorder %s2727_s29, 1 }
   0x8   : > { %s3583_s10 = scalar_select %p177_p1, %s3499_s26, %s179_s8  }
   0x9   : > { %p3585_p5 = por %p190_p2, %p189_p0  ;;  %p3589_p6 = por %p196_p4, %p195_p3 }
   0xa   : > { %p2730_p7 = scmp.ge.s32.totalorder %s3503_s27, 1  ;;  %p240_p8 = scmp.lt.s32.totalorder %s3503_s27, 3 }
   0xc   : > { %p241_p9 = pnand %p2730_p7, %p240_p8 }
   0xd   : > { %v3405_v0 = vld [vmem:[%s4229_s3 + $0x10] sm:$0xff] (!%p241_p9)   ;;  %p271_p10 = scmp.lt.s32.totalorder (!%p241_p9), %s3568_s28, 1  ;;  %v3406_v1 = vld [vmem:[%s4229_s3 + $0x18] sm:$0xff] (!%p241_p9)   ;;  %v3608_v2 = vld [vmem:[%s4227_s1] ss:$0 sm:$0xff] (!%p241_p9)  ;;  %vm500_vm0 = vcmask (!%p241_p9), 261120  }
   0xe   : > { %244 = sbr.rel (%p241_p9) target bundleno = 820 (0x334), region = 48  ;;  %3021 = vmatprep.subr.bf16.mxu0 (!%p241_p9), %v3405_v0  ;;  %vm502_vm1 = vcmask (!%p241_p9), 254976   ;;  %v3505_v3 = vmov (!%p241_p9), 0.0   ;;  %v3654_v4 = vld [vmem:[%s4229_s3] sm:$0xff] (!%p241_p9)   ;;  %vm475_vm2 = vcmask (!%p241_p9), 1040384   ;;  %s269_s14 = sand.u32 (!%p241_p9), 1, %s3495_s25  }
   0xf   : > { %3022 = vmatpush3.bf16.msra.mxu0 (!%p241_p9), %v3405_v0  ;;  %501 = vst.msk [vmem:[#allocation2] sm:$0xff] (!%p241_p9), %vm500_vm0, %v3505_v3  ;;  %504 = vst.msk [vmem:[#allocation2 + $0x10] sm:$0xff] (!%p241_p9), %vm500_vm0, %v3505_v3  ;;  %v3666_v5 = vld [vmem:[%s4228_s2] ss:$0 sm:$0xff] (!%p241_p9)  ;;  %s2909_s15 = sshll.u32 (!%p241_p9), %s3568_s28, 4  ;;  %s270_s16 = scalar_lea.vmem (!%p241_p9), [#allocation4], %s269_s14 }
  0x10   : > { %3023 = vmatprep.subr.bf16.mxu0 (!%p241_p9), %v3406_v1  ;;  %503 = vst.msk [vmem:[#allocation2 + $0x8] sm:$0x3] (!%p241_p9), %vm502_vm1, %v3505_v3  ;;  %505 = vst.msk [vmem:[#allocation2 + $0x18] sm:$0x3] (!%p241_p9), %vm502_vm1, %v3505_v3  ;;  %vm2657_vm3 = vcmask (!%p241_p9), 253952   ;;  %s2660_s21 = scalar_lea.sflag (!%p241_p9), [#allocation5], %s269_s14 }
  0x11   : > { %506 = vst.msk [vmem:[#allocation2 + $0x20] sm:$0xff] (!%p241_p9), %vm500_vm0, %v3505_v3  ;;  %508 = vst.msk [vmem:[#allocation2 + $0x30] sm:$0xff] (!%p241_p9), %vm500_vm0, %v3505_v3 }
  0x12   : > { %507 = vst.msk [vmem:[#allocation2 + $0x28] sm:$0x3] (!%p241_p9), %vm502_vm1, %v3505_v3  ;;  %509 = vst.msk [vmem:[#allocation2 + $0x38] sm:$0x3] (!%p241_p9), %vm502_vm1, %v3505_v3 }
  0x13   : > { %510 = vst.msk [vmem:[#allocation2 + $0x40] sm:$0xff] (!%p241_p9), %vm500_vm0, %v3505_v3  ;;  %512 = vst.msk [vmem:[#allocation2 + $0x50] sm:$0xff] (!%p241_p9), %vm500_vm0, %v3505_v3  ;;  %3024 = vmatpush3.bf16.msra.mxu0 (!%p241_p9), %v3406_v1 }
  0x14   : > { %511 = vst.msk [vmem:[#allocation2 + $0x48] sm:$0x3] (!%p241_p9), %vm502_vm1, %v3505_v3  ;;  %513 = vst.msk [vmem:[#allocation2 + $0x58] sm:$0x3] (!%p241_p9), %vm502_vm1, %v3505_v3  ;;  %3033 = vmatprep.subr.bf16.mxu0 (!%p241_p9), %v3654_v4 }
  0x15   : > { %s3603_s17 = scalar_select %p271_p10, %s3568_s28, 1  ;;  %514 = vst.msk [vmem:[#allocation2 + $0x60] sm:$0xff] %vm500_vm0, %v3505_v3  ;;  %516 = vst.msk [vmem:[#allocation2 + $0x70] sm:$0xff] %vm500_vm0, %v3505_v3 }
  0x16   : > { %515 = vst.msk [vmem:[#allocation2 + $0x68] sm:$0x3] %vm502_vm1, %v3505_v3  ;;  %517 = vst.msk [vmem:[#allocation2 + $0x78] sm:$0x3] %vm502_vm1, %v3505_v3  ;;  %s3506_s28 = smov [#allocation4]  }
  0x17   : > { %s2912_s20 = sshll.u32 %s3603_s17, 8  ;;  %518 = vst.msk [vmem:[#allocation2 + $0x80] sm:$0xff] %vm500_vm0, %v3505_v3  ;;  %520 = vst.msk [vmem:[#allocation2 + $0x90] sm:$0xff] %vm500_vm0, %v3505_v3  ;;  %s2672_s17 = sshll.u32 %s270_s16, 4  ;;  %s4186_s17 = int_to_ptr.vmem [resolvable:$true] %s2672_s17 }
  0x18   : > { %519 = vst.msk [vmem:[#allocation2 + $0x88] sm:$0x3] %vm502_vm1, %v3505_v3  ;;  %521 = vst.msk [vmem:[#allocation2 + $0x98] sm:$0x3] %vm502_vm1, %v3505_v3  ;;  %s3661_s8 = scalar_lea.vmem %s4226_s0, %s2912_s20  ;;  %s4184_s20 = scalar_lea.hbm %s4233_s7, %s2909_s15 }
  0x19   : > { %1564 = vst.msk [vmem:[#allocation3] sm:$0xff] %vm500_vm0, %v3505_v3  ;;  %1566 = vst.msk [vmem:[#allocation3 + $0x10] sm:$0xff] %vm500_vm0, %v3505_v3  ;;  %v277_v6 = vld [vmem:[%s3661_s8] sm:$0xff]  ;;  %v278_v7 = vld [vmem:[%s3661_s8 + $0x8] sm:$0xff]  ;;  %s3441_s22 = scalar_lea.vmem %s4186_s17, 16  ;;  %s3445_s23 = sshll.u32 %s3506_s28, 4  ;;  %s3446_s23 = int_to_ptr.vmem [resolvable:$false] %s3445_s23 }
  0x1a   : > { %1565 = vst.msk [vmem:[#allocation3 + $0x8] sm:$0x3] %vm502_vm1, %v3505_v3  ;;  %1567 = vst.msk [vmem:[#allocation3 + $0x18] sm:$0x3] %vm502_vm1, %v3505_v3  ;;  %v285_v8 = vld [vmem:[%s3661_s8 + $0x40] sm:$0xff]  ;;  %v286_v9 = vld [vmem:[%s3661_s8 + $0x48] sm:$0xff]  ;;  %v316_v12 = vmul.f32 %v3608_v2, %v277_v6  ;;  %v317_v13 = vmul.f32 %v3608_v2, %v278_v7  ;;  %p3442_p11 = scmp.ne.s32.totalorder %s4186_s17, %s3441_s22  ;;  %p3448_p0 = scmp.lt.s32.totalorder %s4186_s17, %s3446_s23 }
  0x1b   : > { %1568 = vst.msk [vmem:[#allocation3 + $0x20] sm:$0xff] %vm500_vm0, %v3505_v3  ;;  %1570 = vst.msk [vmem:[#allocation3 + $0x30] sm:$0xff] %vm500_vm0, %v3505_v3  ;;  %v293_v10 = vld [vmem:[%s3661_s8 + $0x80] sm:$0xff]  ;;  %v294_v11 = vld [vmem:[%s3661_s8 + $0x88] sm:$0xff]  ;;  %v324_v14 = vmul.f32 %v3608_v2, %v285_v8  ;;  %v325_v17 = vmul.f32 %v3608_v2, %v286_v9  ;;  %s3447_s29 = scalar_lea.vmem %s3446_s23, 32 }
  0x1c   : > { %1569 = vst.msk [vmem:[#allocation3 + $0x28] sm:$0x3] %vm502_vm1, %v3505_v3  ;;  %1571 = vst.msk [vmem:[#allocation3 + $0x38] sm:$0x3] %vm502_vm1, %v3505_v3  ;;  %v301_v15 = vld [vmem:[%s3661_s8 + $0xc0] sm:$0xff]  ;;  %v302_v16 = vld [vmem:[%s3661_s8 + $0xc8] sm:$0xff]  ;;  %v332_v18 = vmul.f32 %v3608_v2, %v293_v10  ;;  %v333_v19 = vmul.f32 %v3608_v2, %v294_v11  ;;  %v355_v22 = vadd.f32 %v3666_v5, %v316_v12  ;;  %p3443_p12 = pnand %p3442_p11, %p3585_p5  ;;  %p3449_p1 = scmp.lt.s32.totalorder %s3447_s29, %s3441_s22 }
  0x1d   : > { %1572 = vst.msk [vmem:[#allocation3 + $0x40] sm:$0xff] %vm500_vm0, %v3505_v3  ;;  %1574 = vst.msk [vmem:[#allocation3 + $0x50] sm:$0xff] %vm500_vm0, %v3505_v3  ;;  %v340_v20 = vmul.f32 %v3608_v2, %v301_v15  ;;  %v341_v21 = vmul.f32 %v3608_v2, %v302_v16  ;;  %v356_v23 = vadd.f32 %v3666_v5, %v317_v13  ;;  %v279_v28 = vld [vmem:[%s3661_s8 + $0x10] sm:$0xff]  ;;  %v280_v52 = vld [vmem:[%s3661_s8 + $0x18] sm:$0xff] }
  0x1e   : > { %1573 = vst.msk [vmem:[#allocation3 + $0x48] sm:$0x3] %vm502_vm1, %v3505_v3  ;;  %1575 = vst.msk [vmem:[#allocation3 + $0x58] sm:$0x3] %vm502_vm1, %v3505_v3  ;;  %v363_v24 = vadd.f32 %v3666_v5, %v324_v14  ;;  %v364_v25 = vadd.f32 %v3666_v5, %v325_v17  ;;  %v371_v26 = vadd.f32 %v3666_v5, %v332_v18  ;;  %v287_v29 = vld [vmem:[%s3661_s8 + $0x50] sm:$0xff]  ;;  %v387_v32 = vmax.f32 %v355_v22, 0.0  ;;  %p3444_p13 = pneg %p3443_p12  ;;  %p3450_p2 = por %p3449_p1, %p3448_p0 }
  0x1f   : > { %1576 = vst.msk [vmem:[#allocation3 + $0x60] sm:$0xff] %vm500_vm0, %v3505_v3  ;;  %1578 = vst.msk [vmem:[#allocation3 + $0x70] sm:$0xff] %vm500_vm0, %v3505_v3  ;;  %v372_v27 = vadd.f32 %v3666_v5, %v333_v19  ;;  %v379_v30 = vadd.f32 %v3666_v5, %v340_v20  ;;  %v380_v31 = vadd.f32 %v3666_v5, %v341_v21  ;;  %v388_v33 = vmax.f32 %v356_v23, 0.0  ;;  %v295_v34 = vld [vmem:[%s3661_s8 + $0x90] sm:$0xff]  ;;  %v281_v53 = vld [vmem:[%s3661_s8 + $0x20] sm:$0xff] }
  0x20   : > { %1577 = vst.msk [vmem:[#allocation3 + $0x68] sm:$0x3] %vm502_vm1, %v3505_v3  ;;  %1579 = vst.msk [vmem:[#allocation3 + $0x78] sm:$0x3] %vm502_vm1, %v3505_v3  ;;  %v303_v35 = vld [vmem:[%s3661_s8 + $0xd0] sm:$0xff]  ;;  %v395_v36 = vmax.f32 %v363_v24, 0.0  ;;  %v318_v42 = vmul.f32 %v3608_v2, %v279_v28  ;;  %v326_v43 = vmul.f32 %v3608_v2, %v287_v29  ;;  %v334_v46 = vmul.f32 %v3608_v2, %v295_v34  ;;  %p3451_p3 = pnand %p3450_p2, %p3444_p13 }
  0x21   : > { %1580 = vst.msk [vmem:[#allocation3 + $0x80] sm:$0xff] %vm500_vm0, %v3505_v3  ;;  %1582 = vst.msk [vmem:[#allocation3 + $0x90] sm:$0xff] %vm500_vm0, %v3505_v3  ;;  %v396_v37 = vmax.f32 %v364_v25, 0.0  ;;  %v403_v38 = vmax.f32 %v371_v26, 0.0  ;;  %v404_v39 = vmax.f32 %v372_v27, 0.0  ;;  %v411_v40 = vmax.f32 %v379_v30, 0.0 }
  0x22   : > { %1581 = vst.msk [vmem:[#allocation3 + $0x88] sm:$0x3] %vm502_vm1, %v3505_v3  ;;  %1583 = vst.msk [vmem:[#allocation3 + $0x98] sm:$0x3] %vm502_vm1, %v3505_v3  ;;  %v412_v41 = vmax.f32 %v380_v31, 0.0  ;;  %v342_v47 = vmul.f32 %v3608_v2, %v303_v35  ;;  %v357_v50 = vadd.f32 %v3666_v5, %v318_v42  ;;  %v365_v51 = vadd.f32 %v3666_v5, %v326_v43  ;;  %v288_v58 = vld [vmem:[%s3661_s8 + $0x58] sm:$0xff] }
  0x23   : > { %v419_v44 = vmax.f32 %v387_v32, %v403_v38  ;;  %v420_v45 = vmax.f32 %v388_v33, %v404_v39  ;;  %v435_v48 = vmax.f32 %v395_v36, %v411_v40  ;;  %v3706_v56 = vadd.f32 %v3666_v5, %v334_v46  ;;  %v289_v59 = vld [vmem:[%s3661_s8 + $0x60] sm:$0xff]  ;;  %v296_v0 = vld [vmem:[%s3661_s8 + $0x98] sm:$0xff]  ;;  %v282_v31 = vld [vmem:[%s3661_s8 + $0x28] sm:$0xff] }
  0x24   : > { %v436_v49 = vmax.f32 %v396_v37, %v412_v41  ;;  %v3709_v57 = vadd.f32 %v3666_v5, %v342_v47  ;;  %v389_v62 = vmax.f32 %v357_v50, 0.0  ;;  %v397_v63 = vmax.f32 %v365_v51, 0.0  ;;  %v297_v6 = vld [vmem:[%s3661_s8 + $0xa0] sm:$0xff]  ;;  %v304_v7 = vld [vmem:[%s3661_s8 + $0xd8] sm:$0xff]  ;;  %v283_v32 = vld [vmem:[%s3661_s8 + $0x30] sm:$0xff] }
  0x25   : > { %v427_v54 = vmax.f32 %v419_v44, 0.0  ;;  %v428_v55 = vmax.f32 %v420_v45, %v403_v38  ;;  %v443_v60 = vmax.f32 %v435_v48, 0.0  ;;  %v405_v1 = vmax.f32 %v3706_v56, 0.0  ;;  %v305_v16 = vld [vmem:[%s3661_s8 + $0xe0] sm:$0xff]  ;;  %v290_v37 = vld [vmem:[%s3661_s8 + $0x68] sm:$0xff]  ;;  %v291_v38 = vld [vmem:[%s3661_s8 + $0x70] sm:$0xff] }
  0x26   : > { %v444_v61 = vmax.f32 %v436_v49, %v411_v40  ;;  %v413_v3 = vmax.f32 %v3709_v57, 0.0  ;;  %v319_v8 = vmul.f32 %v3608_v2, %v280_v52  ;;  %v320_v9 = vmul.f32 %v3608_v2, %v281_v53  ;;  %v298_v43 = vld [vmem:[%s3661_s8 + $0xa8] sm:$0xff]  ;;  %v299_v44 = vld [vmem:[%s3661_s8 + $0xb0] sm:$0xff] }
  0x27   : > { %v459_v10 = vrot.slane %v443_v60, 7  ;;  %v484_v11 = vmax.f32 %v427_v54, %v443_v60  ;;  %v421_v14 = vmax.f32 %v389_v62, %v405_v1  ;;  %v327_v17 = vmul.f32 %v3608_v2, %v288_v58  ;;  %v306_v49 = vld [vmem:[%s3661_s8 + $0xe8] sm:$0xff]  ;;  %v307_v54 = vld [vmem:[%s3661_s8 + $0xf0] sm:$0xff] }
  0x28   : > { %v460_v12 = vrot.slane %v444_v61, 7  ;;  %v485_v13 = vmax.f32 %v428_v55, %v444_v61  ;;  %v437_v15 = vmax.f32 %v397_v63, %v413_v3  ;;  %v328_v18 = vmul.f32 %v3608_v2, %v289_v59  ;;  %v547_v61 = vld [vmem:[#allocation2 + $0x1] sm:$0xff] }
  0x29   : > { %v476_v19 = vsel %vm475_vm2, 0.0, %v459_v10  ;;  %v335_v21 = vmul.f32 %v3608_v2, %v296_v0  ;;  %v336_v22 = vmul.f32 %v3608_v2, %v297_v6  ;;  %v429_v24 = vmax.f32 %v421_v14, %v404_v39 }
  0x2a   : > { %v477_v20 = vsel %vm475_vm2, 0.0, %v460_v12  ;;  %v3731_v23 = vmax.f32 %v484_v11, %v476_v19  ;;  %v445_v25 = vmax.f32 %v437_v15, %v412_v41  ;;  %v343_v27 = vmul.f32 %v3608_v2, %v304_v7 }
  0x2b   : > { %v3733_v26 = vmax.f32 %v485_v13, %v477_v20  ;;  %v344_v28 = vmul.f32 %v3608_v2, %v305_v16  ;;  %v358_v29 = vadd.f32 %v3666_v5, %v319_v8  ;;  %v359_v30 = vadd.f32 %v3666_v5, %v320_v9 }
  0x2c   : > { %523 = vst.msk [vmem:[#allocation2 + $0x11] sm:$0xff] %vm500_vm0, %v3731_v23  ;;  %v461_v33 = vrot.slane %v445_v25, 7  ;;  %v486_v34 = vmax.f32 %v429_v24, %v445_v25  ;;  %v366_v35 = vadd.f32 %v3666_v5, %v327_v17  ;;  %v367_v36 = vadd.f32 %v3666_v5, %v328_v18 }
  0x2d   : > { %524 = vst.msk [vmem:[#allocation2 + $0x21] sm:$0xff] %vm500_vm0, %v3733_v26  ;;  %v374_v39 = vadd.f32 %v3666_v5, %v335_v21  ;;  %v3751_v40 = vadd.f32 %v3666_v5, %v336_v22  ;;  %v382_v41 = vadd.f32 %v3666_v5, %v343_v27  ;;  %v3755_v42 = vadd.f32 %v3666_v5, %v344_v28 }
  0x2e   : > { %v478_v45 = vsel %vm475_vm2, 0.0, %v461_v33  ;;  %v390_v46 = vmax.f32 %v358_v29, 0.0  ;;  %v391_v47 = vmax.f32 %v359_v30, 0.0  ;;  %v398_v48 = vmax.f32 %v366_v35, 0.0 }
  0x2f   : > { %v3761_v50 = vmax.f32 %v486_v34, %v478_v45  ;;  %v399_v51 = vmax.f32 %v367_v36, 0.0  ;;  %v406_v52 = vmax.f32 %v374_v39, 0.0  ;;  %v407_v53 = vmax.f32 %v3751_v40, 0.0  ;;  %v3408_v34 = vld [vmem:[%s4229_s3 + $0x8] sm:$0xff]   ;;  %v300_v45 = vld [vmem:[%s3661_s8 + $0xb8] sm:$0xff] }
  0x30   : > { %v414_v55 = vmax.f32 %v382_v41, 0.0  ;;  %v415_v58 = vmax.f32 %v3755_v42, 0.0  ;;  %v321_v59 = vmul.f32 %v3608_v2, %v282_v31  ;;  %v322_v60 = vmul.f32 %v3608_v2, %v283_v32 }
  0x31   : > { %525 = vst.msk [vmem:[#allocation2 + $0x31] sm:$0xff] %vm500_vm0, %v3761_v50  ;;  %v422_v62 = vmax.f32 %v390_v46, %v406_v52  ;;  %v423_v63 = vmax.f32 %v391_v47, %v407_v53  ;;  %v329_v0 = vmul.f32 %v3608_v2, %v290_v37  ;;  %v330_v6 = vmul.f32 %v3608_v2, %v291_v38 }
  0x32   : > { %v438_v7 = vmax.f32 %v398_v48, %v414_v55  ;;  %v439_v8 = vmax.f32 %v399_v51, %v415_v58  ;;  %v337_v9 = vmul.f32 %v3608_v2, %v298_v43  ;;  %v338_v10 = vmul.f32 %v3608_v2, %v299_v44  ;;  %v284_v43 = vld [vmem:[%s3661_s8 + $0x38] sm:$0xff] }
  0x33   : > { %v3778_v11 = vld [vmem:[#allocation2 + $0x11] sm:$0xff]  ;;  %v430_v12 = vmax.f32 %v422_v62, %v405_v1  ;;  %v431_v13 = vmax.f32 %v423_v63, %v406_v52  ;;  %v345_v14 = vmul.f32 %v3608_v2, %v306_v49  ;;  %v346_v15 = vmul.f32 %v3608_v2, %v307_v54  ;;  %v3832_v52 = vld [vmem:[%s4229_s3 + $0x20] sm:$0xff]  }
  0x34   : > { %v555_v16 = vpack.c.bf16 %v3778_v11, %v547_v61  ;;  %v446_v17 = vmax.f32 %v438_v7, %v413_v3  ;;  %v447_v18 = vmax.f32 %v439_v8, %v414_v55  ;;  %v360_v19 = vadd.f32 %v3666_v5, %v321_v59  ;;  %v3793_v22 = vld [vmem:[#allocation2 + $0x21] sm:$0xff]  ;;  %v292_v44 = vld [vmem:[%s3661_s8 + $0x78] sm:$0xff] }
  0x35   : > { %v361_v20 = vadd.f32 %v3666_v5, %v322_v60  ;;  %v368_v21 = vadd.f32 %v3666_v5, %v329_v0  ;;  %v369_v56 = vadd.f32 %v3666_v5, %v330_v6  ;;  %v376_v1 = vadd.f32 %v3666_v5, %v337_v9  ;;  %v308_v51 = vld [vmem:[%s3661_s8 + $0xf8] sm:$0xff] }
  0x36   : > { %3025 = vmatprep.mubr.msk.bf16.mxu0 %vm500_vm0, %v555_v16  ;;  %v462_v24 = vrot.slane %v446_v17, 7  ;;  %v463_v25 = vrot.slane %v447_v18, 7  ;;  %v487_v27 = vmax.f32 %v430_v12, %v446_v17  ;;  %v488_v57 = vmax.f32 %v431_v13, %v447_v18 }
  0x37   : > { %v3796_v3 = vadd.f32 %v3666_v5, %v338_v10  ;;  %v384_v28 = vadd.f32 %v3666_v5, %v345_v14  ;;  %v3800_v29 = vadd.f32 %v3666_v5, %v346_v15  ;;  %v392_v30 = vmax.f32 %v360_v19, 0.0 }
  0x38   : > { %v3802_v31 = vld [vmem:[#allocation2 + $0x31] sm:$0xff]  ;;  %v479_v32 = vsel %vm475_vm2, 0.0, %v462_v24  ;;  %v480_v33 = vsel %vm475_vm2, 0.0, %v463_v25  ;;  %v393_v35 = vmax.f32 %v361_v20, 0.0  ;;  %v400_v36 = vmax.f32 %v368_v21, 0.0 }
  0x39   : > { %v3811_v37 = vpack.c.bf16 %v3802_v31, %v3793_v22  ;;  %v3813_v38 = vmax.f32 %v487_v27, %v479_v32  ;;  %v3815_v39 = vmax.f32 %v488_v57, %v480_v33  ;;  %v401_v41 = vmax.f32 %v369_v56, 0.0 }
  0x3a   : > { %v408_v46 = vmax.f32 %v376_v1, 0.0  ;;  %v409_v47 = vmax.f32 %v3796_v3, 0.0  ;;  %v416_v48 = vmax.f32 %v384_v28, 0.0  ;;  %v417_v49 = vmax.f32 %v3800_v29, 0.0  ;;  %v531_v3 = vld [vmem:[#allocation2] sm:$0xff]  ;;  %v532_v28 = vld [vmem:[#allocation2 + $0x10] sm:$0xff] }
  0x3b   : > { %3026 = vmatmul.mubr.msk.bf16.vlgmr.msra.gmra.mrb[0].mxu0 %vm500_vm0, %v3811_v37  ;;  %526 = vst.msk [vmem:[#allocation2 + $0x41] sm:$0xff] %vm500_vm0, %v3813_v38  ;;  %527 = vst.msk [vmem:[#allocation2 + $0x51] sm:$0xff] %vm500_vm0, %v3815_v39  ;;  %v323_v61 = vmul.f32 %v3608_v2, %v284_v43  ;;  %v331_v62 = vmul.f32 %v3608_v2, %v292_v44  ;;  %v339_v63 = vmul.f32 %v3608_v2, %v300_v45  ;;  %v533_v44 = vld [vmem:[#allocation2 + $0x20] sm:$0xff]  ;;  %v534_v45 = vld [vmem:[#allocation2 + $0x30] sm:$0xff] }
  0x3c   : > { %3034 = vmatpush3.bf16.msra.mxu0 %v3654_v4  ;;  %v424_v54 = vmax.f32 %v392_v30, %v408_v46  ;;  %v425_v55 = vmax.f32 %v393_v35, %v409_v47  ;;  %v440_v59 = vmax.f32 %v400_v36, %v416_v48  ;;  %v441_v60 = vmax.f32 %v401_v41, %v417_v49 }
  0x3d   : > { %3035 = vmatprep.subr.bf16.mxu0 %v3408_v34  ;;  %v347_v4 = vmul.f32 %v3608_v2, %v308_v51  ;;  %v362_v9 = vadd.f32 %v3666_v5, %v323_v61  ;;  %v370_v10 = vadd.f32 %v3666_v5, %v331_v62  ;;  %v378_v12 = vadd.f32 %v3666_v5, %v339_v63  ;;  %v3410_v51 = vld [vmem:[%s4229_s3 + $0x28] sm:$0xff]   ;;  %v3411_v61 = vld [vmem:[%s4229_s3 + $0x30] sm:$0xff]  }
  0x3e   : > { %v432_v0 = vmax.f32 %v424_v54, %v407_v53  ;;  %v433_v6 = vmax.f32 %v425_v55, %v408_v46  ;;  %v448_v7 = vmax.f32 %v440_v59, %v415_v58  ;;  %v449_v8 = vmax.f32 %v441_v60, %v416_v48  ;;  %v742_v59 = vld [vmem:[#allocation2 + $0x2] sm:$0xff]  ;;  %v743_v60 = vld [vmem:[#allocation2 + $0x12] sm:$0xff] }
  0x3f   : > { %v386_v40 = vadd.f32 %v3666_v5, %v347_v4  ;;  %v394_v42 = vmax.f32 %v362_v9, 0.0  ;;  %v410_v53 = vmax.f32 %v378_v12, 0.0  ;;  %v402_v19 = vmax.f32 %v370_v10, 0.0  ;;  %v3412_v9 = vld [vmem:[%s4229_s3 + $0x38] sm:$0xff]  }
  0x40   : > { %v464_v13 = vrot.slane %v448_v7, 7  ;;  %v465_v14 = vrot.slane %v449_v8, 7  ;;  %v489_v15 = vmax.f32 %v432_v0, %v448_v7  ;;  %v490_v16 = vmax.f32 %v433_v6, %v449_v8  ;;  %3036 = vmatpush3.bf16.msra.mxu0 %v3408_v34  ;;  %v745_v0 = vld [vmem:[#allocation2 + $0x32] sm:$0xff] }
  0x41   : > { %3045 = vmatprep.subr.bf16.mxu0 %v3832_v52  ;;  %v978_v20 = vpack.c.bf16 %v3793_v22, %v3778_v11  ;;  %v418_v1 = vmax.f32 %v386_v40, 0.0  ;;  %v426_v24 = vmax.f32 %v394_v42, %v410_v53  ;;  %v539_v35 = vpack.c.bf16 %v532_v28, %v531_v3  ;;  %v3414_v42 = vld [vmem:[%s4229_s3 + $0x48] sm:$0xff]   ;;  %v3417_v11 = vld [vmem:[%s4229_s3 + $0x60] sm:$0xff]   ;;  %v3420_v3 = vld [vmem:[%s4229_s3 + $0x78] sm:$0xff]  }
  0x42   : > { %v3848_v58 = vld [vmem:[#allocation2 + $0x41] sm:$0xff]  ;;  %v3850_v2 = vld [vmem:[#allocation2 + $0x51] sm:$0xff]  ;;  %v481_v17 = vsel %vm475_vm2, 0.0, %v464_v13  ;;  %v482_v18 = vsel %vm475_vm2, 0.0, %v465_v14  ;;  %v3888_v48 = vpack.c.bf16 %v534_v45, %v533_v44  ;;  %v750_v63 = vpack.c.bf16 %v743_v60, %v742_v59 }
  0x43   : > { %v3858_v21 = vpack.c.bf16 %v3850_v2, %v3848_v58  ;;  %v3860_v56 = vmax.f32 %v489_v15, %v481_v17  ;;  %v3862_v5 = vmax.f32 %v490_v16, %v482_v18  ;;  %v979_v25 = vpack.c.bf16 %v3848_v58, %v3802_v31  ;;  %v535_v46 = vld [vmem:[#allocation2 + $0x40] sm:$0xff]  ;;  %v747_v7 = vld [vmem:[#allocation2 + $0x52] sm:$0xff] }
  0x44   : > { %v434_v27 = vmax.f32 %v426_v24, %v409_v47  ;;  %v442_v57 = vmax.f32 %v402_v19, %v418_v1  ;;  %v536_v47 = vld [vmem:[#allocation2 + $0x50] sm:$0xff]  ;;  %v746_v6 = vld [vmem:[#allocation2 + $0x42] sm:$0xff]  ;;  %v864_v15 = vpack.c.bf16 %v533_v44, %v532_v28  ;;  %v865_v16 = vpack.c.bf16 %v535_v46, %v534_v45  ;;  %v3416_v1 = vld [vmem:[%s4229_s3 + $0x58] sm:$0xff]  }
  0x45   : > { %3029 = vmatprep.mubr.msk.bf16.mxu0 %vm500_vm0, %v3858_v21  ;;  %528 = vst.msk [vmem:[#allocation2 + $0x61] sm:$0xff] %vm500_vm0, %v3860_v56  ;;  %529 = vst.msk [vmem:[#allocation2 + $0x71] sm:$0xff] %vm500_vm0, %v3862_v5  ;;  %v3910_v4 = vpack.c.bf16 %v747_v7, %v746_v6  ;;  %v3413_v13 = vld [vmem:[%s4229_s3 + $0x40] sm:$0xff]   ;;  %v3415_v17 = vld [vmem:[%s4229_s3 + $0x50] sm:$0xff]   ;;  %v1093_v31 = vpack.c.bf16 %v746_v6, %v745_v0 }
  0x46   : > { %v450_v29 = vmax.f32 %v442_v57, %v417_v49  ;;  %v3890_v49 = vpack.c.bf16 %v536_v47, %v535_v46  ;;  %v1206_v28 = vld [vmem:[#allocation2 + $0x90] sm:$0xff]  ;;  %v2821_v44 = vld [vmem:[%s4230_s4] ss:$0 sm:$0xff] }
  0x48   : > { %v466_v30 = vrot.slane %v450_v29, 7  ;;  %v491_v32 = vmax.f32 %v434_v27, %v450_v29  ;;  %v3419_v27 = vld [vmem:[%s4229_s3 + $0x70] sm:$0xff]   ;;  %v3421_v29 = vld [vmem:[%s4229_s3 + $0x80] sm:$0xff]  }
  0x4a   : > { %v483_v36 = vsel %vm475_vm2, 0.0, %v466_v30 }
  0x4b   : > { %v3881_v43 = vmax.f32 %v491_v32, %v483_v36  ;;  %v3422_v32 = vld [vmem:[%s4229_s3 + $0x88] sm:$0xff]   ;;  %v3424_v36 = vld [vmem:[%s4231_s5 + $0x18] sm:$0xff]  }
  0x4c   : > { %v3872_v33 = vld [vmem:[#allocation2 + $0x61] sm:$0xff]  ;;  %v3874_v34 = vld [vmem:[#allocation2 + $0x71] sm:$0xff] }
  0x4d   : > { %v3879_v41 = vpack.c.bf16 %v3874_v34, %v3872_v33  ;;  %530 = vst.msk [vmem:[#allocation2 + $0x81] sm:$0xff] %vm500_vm0, %v3881_v43  ;;  %v537_v54 = vld [vmem:[#allocation2 + $0x60] sm:$0xff]  ;;  %v538_v55 = vld [vmem:[#allocation2 + $0x70] sm:$0xff]  ;;  %v980_v19 = vpack.c.bf16 %v3872_v33, %v3850_v2 }
  0x4e   : > { %v3903_v62 = vpack.c.bf16 %v538_v55, %v537_v54  ;;  %v748_v10 = vld [vmem:[#allocation2 + $0x62] sm:$0xff]  ;;  %v749_v12 = vld [vmem:[#allocation2 + $0x72] sm:$0xff]  ;;  %v866_v40 = vpack.c.bf16 %v537_v54, %v536_v47 }
  0x4f   : > { %3030 = vmatmul.mubr.msk.bf16.gmra.mrb[4].mxu0 %vm500_vm0, %v3879_v41  ;;  %v3922_v14 = vpack.c.bf16 %v749_v12, %v748_v10  ;;  %v1094_v58 = vpack.c.bf16 %v748_v10, %v747_v7  ;;  %v1320_v33 = vld [vmem:[#allocation2 + $0x91] sm:$0xff]  ;;  %v1609_v10 = vld [vmem:[#allocation3 + $0x1] sm:$0xff] }
  0x50   : > { %3037 = vmatprep.mubr.msk.bf16.mxu0 %vm500_vm0, %v539_v35  ;;  %v3423_v35 = vld [vmem:[%s4231_s5 + $0x10] sm:$0xff]  }
  0x51   : > { %3129 = vmatprep.subr.bf16.mxu1 %v3423_v35 }
  0x52   : > { %3130 = vmatpush3.bf16.msra.mxu1 %v3423_v35 }
  0x53   : > { %3131 = vmatprep.subr.bf16.mxu1 %v3424_v36 }
  0x54   : > { %v863_v53 = vld [vmem:[#allocation2 + $0x80] sm:$0xff] }
  0x55   : > { %v867_v18 = vpack.c.bf16 %v863_v53, %v538_v55  ;;  %v977_v24 = vld [vmem:[#allocation2 + $0x81] sm:$0xff]  ;;  %v1210_v30 = vpack.c.bf16 %v1206_v28, %v863_v53 }
  0x56   : > { %v981_v22 = vpack.c.bf16 %v977_v24, %v3874_v34  ;;  %v1324_v34 = vpack.c.bf16 %v1320_v33, %v977_v24  ;;  %3132 = vmatpush3.bf16.msra.mxu1 %v3424_v36  ;;  %v3429_v33 = vld [vmem:[%s4231_s5 + $0x30] sm:$0xff]  }
  0x57   : > { %3038 = vmatmul.mubr.msk.bf16.vlgmr.msra.gmra.mrb[0].mxu0 %vm500_vm0, %v3888_v48 }
  0x58   : > { %3046 = vmatpush3.bf16.msra.mxu0 %v3832_v52  ;;  %3041 = vmatprep.mubr.msk.bf16.mxu0 %vm500_vm0, %v3890_v49  ;;  %v744_v52 = vld [vmem:[#allocation2 + $0x22] sm:$0xff] }
  0x59   : > { %3047 = vmatprep.subr.bf16.mxu0 %v3410_v51  ;;  %v3908_v8 = vpack.c.bf16 %v745_v0, %v744_v52  ;;  %v1092_v2 = vpack.c.bf16 %v744_v52, %v743_v60 }
  0x5c   : > { %3048 = vmatpush3.bf16.msra.mxu0 %v3410_v51 }
  0x5d   : > { %3057 = vmatprep.subr.bf16.mxu0 %v3411_v61 }
  0x5f   : > { %3042 = vmatmul.mubr.msk.bf16.gmra.mrb[4].mxu0 %vm500_vm0, %v3903_v62 }
  0x60   : > { %3049 = vmatprep.mubr.msk.bf16.mxu0 %vm500_vm0, %v750_v63 }
  0x67   : > { %3050 = vmatmul.mubr.msk.bf16.vlgmr.msra.gmra.mrb[0].mxu0 %vm500_vm0, %v3908_v8 }
  0x68   : > { %3058 = vmatpush3.bf16.msra.mxu0 %v3411_v61  ;;  %3053 = vmatprep.mubr.msk.bf16.mxu0 %vm500_vm0, %v3910_v4 }
  0x69   : > { %3059 = vmatprep.subr.bf16.mxu0 %v3412_v9 }
  0x6c   : > { %3060 = vmatpush3.bf16.msra.mxu0 %v3412_v9 }
  0x6d   : > { %3069 = vmatprep.subr.bf16.mxu0 %v3413_v13 }
  0x6f   : > { %3054 = vmatmul.mubr.msk.bf16.gmra.mrb[4].mxu0 %vm500_vm0, %v3922_v14 }
  0x70   : > { %3061 = vmatprep.mubr.msk.bf16.mxu0 %vm500_vm0, %v864_v15 }
  0x77   : > { %3062 = vmatmul.mubr.msk.bf16.vlgmr.msra.gmra.mrb[0].mxu0 %vm500_vm0, %v865_v16 }
  0x78   : > { %3070 = vmatpush3.bf16.msra.mxu0 %v3413_v13  ;;  %3065 = vmatprep.mubr.msk.bf16.mxu0 %vm500_vm0, %v866_v40 }
  0x79   : > { %3071 = vmatprep.subr.bf16.mxu0 %v3414_v42 }
  0x7c   : > { %3072 = vmatpush3.bf16.msra.mxu0 %v3414_v42 }
  0x7d   : > { %3081 = vmatprep.subr.bf16.mxu0 %v3415_v17 }
  0x7f   : > { %3066 = vmatmul.mubr.msk.bf16.gmra.mrb[4].mxu0 %vm500_vm0, %v867_v18  ;;  %v3426_v18 = vld [vmem:[%s4231_s5 + $0x8] sm:$0xff]  }
  0x80   : > { %3073 = vmatprep.mubr.msk.bf16.mxu0 %vm500_vm0, %v978_v20  ;;  %v3418_v20 = vld [vmem:[%s4229_s3 + $0x68] sm:$0xff]  }
  0x87   : > { %3074 = vmatmul.mubr.msk.bf16.vlgmr.msra.gmra.mrb[0].mxu0 %vm500_vm0, %v979_v25  ;;  %v1091_v25 = vld [vmem:[#allocation2 + $0x82] sm:$0xff] }
  0x88   : > { %3082 = vmatpush3.bf16.msra.mxu0 %v3415_v17  ;;  %3077 = vmatprep.mubr.msk.bf16.mxu0 %vm500_vm0, %v980_v19  ;;  %v1095_v57 = vpack.c.bf16 %v1091_v25, %v749_v12  ;;  %v3427_v19 = vld [vmem:[%s4231_s5 + $0x20] sm:$0xff]  }
  0x89   : > { %3083 = vmatprep.subr.bf16.mxu0 %v3416_v1 }
  0x8c   : > { %3084 = vmatpush3.bf16.msra.mxu0 %v3416_v1 }
  0x8d   : > { %3093 = vmatprep.subr.bf16.mxu0 %v3417_v11 }
  0x8f   : > { %3078 = vmatmul.mubr.msk.bf16.gmra.mrb[4].mxu0 %vm500_vm0, %v981_v22  ;;  %v1593_v22 = vld [vmem:[#allocation3] sm:$0xff] }
  0x90   : > { %3085 = vmatprep.mubr.msk.bf16.mxu0 %vm500_vm0, %v1092_v2 }
  0x97   : > { %3086 = vmatmul.mubr.msk.bf16.vlgmr.msra.gmra.mrb[0].mxu0 %vm500_vm0, %v1093_v31 }
  0x98   : > { %3094 = vmatpush3.bf16.msra.mxu0 %v3417_v11  ;;  %3089 = vmatprep.mubr.msk.bf16.mxu0 %vm500_vm0, %v1094_v58 }
  0x99   : > { %3095 = vmatprep.subr.bf16.mxu0 %v3418_v20 }
  0x9c   : > { %3096 = vmatpush3.bf16.msra.mxu0 %v3418_v20 }
  0x9d   : > { %3105 = vmatprep.subr.bf16.mxu0 %v3419_v27 }
  0x9f   : > { %3090 = vmatmul.mubr.msk.bf16.gmra.mrb[4].mxu0 %vm500_vm0, %v1095_v57 }
  0xa0   : > { %3097 = vmatprep.mubr.msk.bf16.mxu0 %vm500_vm0, %v3888_v48 }
  0xa7   : > { %3098 = vmatmul.mubr.msk.bf16.vlgmr.msra.gmra.mrb[0].mxu0 %vm500_vm0, %v3890_v49 }
  0xa8   : > { %3106 = vmatpush3.bf16.msra.mxu0 %v3419_v27  ;;  %3101 = vmatprep.mubr.msk.bf16.mxu0 %vm500_vm0, %v3903_v62 }
  0xa9   : > { %3107 = vmatprep.subr.bf16.mxu0 %v3420_v3 }
  0xac   : > { %3108 = vmatpush3.bf16.msra.mxu0 %v3420_v3 }
  0xad   : > { %3117 = vmatprep.subr.bf16.mxu0 %v3421_v29 }
  0xaf   : > { %3102 = vmatmul.mubr.msk.bf16.gmra.mrb[4].mxu0 %vm500_vm0, %v1210_v30  ;;  %v3428_v30 = vld [vmem:[%s4231_s5 + $0x28] sm:$0xff]  }
  0xb0   : > { %3109 = vmatprep.mubr.msk.bf16.mxu0 %vm500_vm0, %v3811_v37  ;;  %v1434_v37 = vld [vmem:[#allocation2 + $0x92] sm:$0xff] }
  0xb7   : > { %3110 = vmatmul.mubr.msk.bf16.vlgmr.msra.gmra.mrb[0].mxu0 %vm500_vm0, %v3858_v21  ;;  %v1438_v21 = vpack.c.bf16 %v1434_v37, %v1091_v25  ;;  %v1804_v37 = vld [vmem:[#allocation3 + $0x2] sm:$0xff] }
  0xb8   : > { %3118 = vmatpush3.bf16.msra.mxu0 %v3421_v29  ;;  %3113 = vmatprep.mubr.msk.bf16.mxu0 %vm500_vm0, %v3879_v41  ;;  %v3425_v41 = vld [vmem:[%s4231_s5] sm:$0xff]  }
  0xb9   : > { %3119 = vmatprep.subr.bf16.mxu0 %v3422_v32  ;;  %3141 = vmatprep.subr.bf16.mxu1 %v3425_v41 }
  0xbc   : > { %3120 = vmatpush3.bf16.msra.mxu0 %v3422_v32 }
  0xbf   : > { %3114 = vmatmul.mubr.msk.bf16.gmra.mrb[4].mxu0 %vm500_vm0, %v1324_v34 }
  0xc0   : > { %3121 = vmatprep.mubr.msk.bf16.mxu0 %vm500_vm0, %v3908_v8 }
  0xc7   : > { %3122 = vmatmul.mubr.msk.bf16.vlgmr.msra.gmra.mrb[0].mxu0 %vm500_vm0, %v3910_v4 }
  0xc8   : > { %3125 = vmatprep.mubr.msk.bf16.mxu0 %vm500_vm0, %v3922_v14 }
  0xcf   : > { %3126 = vmatmul.mubr.msk.bf16.gmra.mrb[4].mxu0 %vm500_vm0, %v1438_v21 }
 0x19a   : > { %v3123_v45 = vpop.f32.mrb[0].mxu0 }
 0x19b   : > { %v1550_v46 = vadd.f32 %v3123_v45, %v2821_v44  ;;  %v1502_v47 = vpop.f32.mrb[1].mxu0 }
 0x19c   : > { %v1548_v48 = vadd.f32 %v2821_v44, %v1502_v47  ;;  %v3124_v49 = vpop.f32.mrb[2].mxu0 }
 0x19d   : > { %v1558_v51 = vmax.f32 %v1550_v46, 0.0  ;;  %v1551_v54 = vadd.f32 %v3124_v49, %v2821_v44  ;;  %v1505_v55 = vpop.f32.mrb[3].mxu0  ;;  %v3430_v49 = vld [vmem:[%s4231_s5 + $0x38] sm:$0xff]  }
 0x19e   : > { %v1556_v59 = vmax.f32 %v1548_v48, 0.0  ;;  %v1549_v60 = vadd.f32 %v2821_v44, %v1505_v55 }
 0x19f   : > { %1587 = vst.msk [vmem:[#allocation3 + $0x31] sm:$0xff] %vm500_vm0, %v1558_v51  ;;  %v1559_v61 = vmax.f32 %v1551_v54, 0.0  ;;  %v3431_v54 = vld [vmem:[%s4231_s5 + $0x40] sm:$0xff]  }
 0x1a0   : > { %1585 = vst.msk [vmem:[#allocation3 + $0x11] sm:$0xff] %vm500_vm0, %v1556_v59  ;;  %v1557_v62 = vmax.f32 %v1549_v60, 0.0 }
 0x1a1   : > { %1588 = vst.msk [vmem:[#allocation3 + $0x41] sm:$0xff] %vm500_vm0, %v1559_v61 }
 0x1a2   : > { %1586 = vst.msk [vmem:[#allocation3 + $0x21] sm:$0xff] %vm500_vm0, %v1557_v62  ;;  %v3127_v63 = vpop.f32.mrb[4].mxu0 }
 0x1a3   : > { %v1554_v52 = vadd.f32 %v3127_v63, %v2821_v44  ;;  %v1518_v0 = vpop.f32.mrb[5].mxu0  ;;  %v3432_v63 = vld [vmem:[%s4231_s5 + $0x48] sm:$0xff]  }
 0x1a4   : > { %v1552_v6 = vadd.f32 %v2821_v44, %v1518_v0  ;;  %v3128_v7 = vpop.f32.mrb[6].mxu0  ;;  %v3433_v0 = vld [vmem:[%s4231_s5 + $0x50] sm:$0xff]  }
 0x1a5   : > { %v1562_v8 = vmax.f32 %v1554_v52, 0.0  ;;  %v1555_v4 = vadd.f32 %v3128_v7, %v2821_v44  ;;  %v1521_v9 = vpop.f32.mrb[7].mxu0 }
 0x1a6   : > { %v1560_v12 = vmax.f32 %v1552_v6, 0.0  ;;  %v1553_v13 = vadd.f32 %v2821_v44, %v1521_v9  ;;  %v4019_v53 = vld [vmem:[#allocation3 + $0x31] sm:$0xff] }
 0x1a7   : > { %1591 = vst.msk [vmem:[#allocation3 + $0x71] sm:$0xff] %vm500_vm0, %v1562_v8  ;;  %v1563_v14 = vmax.f32 %v1555_v4, 0.0  ;;  %v4012_v15 = vld [vmem:[#allocation3 + $0x11] sm:$0xff] }
 0x1a8   : > { %1589 = vst.msk [vmem:[#allocation3 + $0x51] sm:$0xff] %vm500_vm0, %v1560_v12  ;;  %v1561_v16 = vmax.f32 %v1553_v13, 0.0  ;;  %v1617_v40 = vpack.c.bf16 %v4012_v15, %v1609_v10  ;;  %v4035_v1 = vld [vmem:[#allocation3 + $0x41] sm:$0xff]  ;;  %v1594_v2 = vld [vmem:[#allocation3 + $0x10] sm:$0xff]  ;;  %v3434_v9 = vld [vmem:[%s4231_s5 + $0x58] sm:$0xff]  }
 0x1a9   : > { %1592 = vst.msk [vmem:[#allocation3 + $0x81] sm:$0xff] %vm500_vm0, %v1563_v14  ;;  %v4017_v42 = vld [vmem:[#allocation3 + $0x21] sm:$0xff]  ;;  %v1601_v25 = vpack.c.bf16 %v1594_v2, %v1593_v22  ;;  %v1596_v3 = vld [vmem:[#allocation3 + $0x30] sm:$0xff]  ;;  %v2041_v4 = vpack.c.bf16 %v4035_v1, %v4019_v53 }
 0x1aa   : > { %1590 = vst.msk [vmem:[#allocation3 + $0x61] sm:$0xff] %vm500_vm0, %v1561_v16  ;;  %3133 = vmatprep.mubr.msk.bf16.mxu1 %vm500_vm0, %v1617_v40  ;;  %v4025_v17 = vpack.c.bf16 %v4019_v53, %v4017_v42  ;;  %v1595_v27 = vld [vmem:[#allocation3 + $0x20] sm:$0xff]  ;;  %v1805_v21 = vld [vmem:[#allocation3 + $0x12] sm:$0xff]  ;;  %v2040_v8 = vpack.c.bf16 %v4017_v42, %v4012_v15  ;;  %v3436_v40 = vld [vmem:[%s4231_s5 + $0x68] sm:$0xff]  }
 0x1ab   : > { %v4056_v28 = vpack.c.bf16 %v1596_v3, %v1595_v27  ;;  %v1597_v29 = vld [vmem:[#allocation3 + $0x40] sm:$0xff]  ;;  %v1807_v46 = vld [vmem:[#allocation3 + $0x32] sm:$0xff]  ;;  %v1926_v61 = vpack.c.bf16 %v1595_v27, %v1594_v2 }
 0x1ac   : > { %3134 = vmatmul.mubr.msk.bf16.vlgmr.msra.gmra.mrb[0].mxu1 %vm500_vm0, %v4025_v17  ;;  %v1806_v44 = vld [vmem:[#allocation3 + $0x22] sm:$0xff]  ;;  %v1927_v62 = vpack.c.bf16 %v1597_v29, %v1596_v3  ;;  %v3437_v53 = vld [vmem:[%s4231_s5 + $0x70] sm:$0xff]  }
 0x1ad   : > { %3142 = vmatpush3.bf16.msra.mxu1 %v3425_v41  ;;  %v1812_v41 = vpack.c.bf16 %v1805_v21, %v1804_v37  ;;  %v4075_v47 = vpack.c.bf16 %v1807_v46, %v1806_v44  ;;  %v1808_v48 = vld [vmem:[#allocation3 + $0x42] sm:$0xff]  ;;  %v2154_v15 = vpack.c.bf16 %v1806_v44, %v1805_v21  ;;  %v2268_v22 = vld [vmem:[#allocation3 + $0x90] sm:$0xff] }
 0x1ae   : > { %3143 = vmatprep.subr.bf16.mxu1 %v3426_v18  ;;  %v4045_v58 = vld [vmem:[#allocation3 + $0x71] sm:$0xff]  ;;  %v3435_v12 = vld [vmem:[%s4231_s5 + $0x60] sm:$0xff]   ;;  %v2155_v16 = vpack.c.bf16 %v1808_v48, %v1807_v46 }
 0x1af   : > { %v4037_v24 = vld [vmem:[#allocation3 + $0x51] sm:$0xff] }
 0x1b0   : > { %v4041_v11 = vpack.c.bf16 %v4037_v24, %v4035_v1  ;;  %v1598_v57 = vld [vmem:[#allocation3 + $0x50] sm:$0xff]  ;;  %v1925_v6 = vld [vmem:[#allocation3 + $0x80] sm:$0xff]  ;;  %v3438_v1 = vld [vmem:[%s4231_s5 + $0x78] sm:$0xff]  }
 0x1b1   : > { %v4043_v31 = vld [vmem:[#allocation3 + $0x61] sm:$0xff]  ;;  %3144 = vmatpush3.bf16.msra.mxu1 %v3426_v18  ;;  %v4061_v32 = vpack.c.bf16 %v1598_v57, %v1597_v29  ;;  %v1600_v35 = vld [vmem:[#allocation3 + $0x70] sm:$0xff]  ;;  %v2272_v2 = vpack.c.bf16 %v2268_v22, %v1925_v6 }
 0x1b2   : > { %3137 = vmatprep.mubr.msk.bf16.mxu1 %vm500_vm0, %v4041_v11  ;;  %v4051_v20 = vpack.c.bf16 %v4045_v58, %v4043_v31  ;;  %3153 = vmatprep.subr.bf16.mxu1 %v3427_v19  ;;  %v1599_v34 = vld [vmem:[#allocation3 + $0x60] sm:$0xff]  ;;  %v1809_v45 = vld [vmem:[#allocation3 + $0x52] sm:$0xff]  ;;  %v1929_v7 = vpack.c.bf16 %v1925_v6, %v1600_v35  ;;  %v2042_v10 = vpack.c.bf16 %v4043_v31, %v4037_v24  ;;  %v3440_v31 = vld [vmem:[%s4231_s5 + $0x88] sm:$0xff]  }
 0x1b3   : > { %v4070_v36 = vpack.c.bf16 %v1600_v35, %v1599_v34  ;;  %v4080_v51 = vpack.c.bf16 %v1809_v45, %v1808_v48  ;;  %v1810_v55 = vld [vmem:[#allocation3 + $0x62] sm:$0xff]  ;;  %v1811_v59 = vld [vmem:[#allocation3 + $0x72] sm:$0xff]  ;;  %v1928_v52 = vpack.c.bf16 %v1599_v34, %v1598_v57 }
 0x1b4   : > { %3138 = vmatmul.mubr.msk.bf16.gmra.mrb[4].mxu1 %vm500_vm0, %v4051_v20  ;;  %v4089_v60 = vpack.c.bf16 %v1811_v59, %v1810_v55  ;;  %v2039_v13 = vld [vmem:[#allocation3 + $0x81] sm:$0xff]  ;;  %v2156_v42 = vpack.c.bf16 %v1810_v55, %v1809_v45 }
 0x1b5   : > { %3145 = vmatprep.mubr.msk.bf16.mxu1 %vm500_vm0, %v1601_v25  ;;  %v2043_v14 = vpack.c.bf16 %v2039_v13, %v4045_v58  ;;  %v2153_v18 = vld [vmem:[#allocation3 + $0x82] sm:$0xff]  ;;  %v2382_v58 = vld [vmem:[#allocation3 + $0x91] sm:$0xff] }
 0x1b6   : > { %v3439_v24 = vld [vmem:[%s4231_s5 + $0x80] sm:$0xff]   ;;  %v2386_v25 = vpack.c.bf16 %v2382_v58, %v2039_v13 }
 0x1bc   : > { %3146 = vmatmul.mubr.msk.bf16.vlgmr.msra.gmra.mrb[0].mxu1 %vm500_vm0, %v4056_v28 }
 0x1bd   : > { %3154 = vmatpush3.bf16.msra.mxu1 %v3427_v19  ;;  %3149 = vmatprep.mubr.msk.bf16.mxu1 %vm500_vm0, %v4061_v32  ;;  %v2157_v19 = vpack.c.bf16 %v2153_v18, %v1811_v59 }
 0x1be   : > { %3155 = vmatprep.subr.bf16.mxu1 %v3428_v30 }
 0x1c1   : > { %3156 = vmatpush3.bf16.msra.mxu1 %v3428_v30 }
 0x1c2   : > { %3165 = vmatprep.subr.bf16.mxu1 %v3429_v33 }
 0x1c4   : > { %3150 = vmatmul.mubr.msk.bf16.gmra.mrb[4].mxu1 %vm500_vm0, %v4070_v36 }
 0x1c5   : > { %3157 = vmatprep.mubr.msk.bf16.mxu1 %vm500_vm0, %v1812_v41 }
 0x1cc   : > { %3158 = vmatmul.mubr.msk.bf16.vlgmr.msra.gmra.mrb[0].mxu1 %vm500_vm0, %v4075_v47 }
 0x1cd   : > { %3166 = vmatpush3.bf16.msra.mxu1 %v3429_v33  ;;  %3161 = vmatprep.mubr.msk.bf16.mxu1 %vm500_vm0, %v4080_v51 }
 0x1ce   : > { %3167 = vmatprep.subr.bf16.mxu1 %v3430_v49 }
 0x1d1   : > { %3168 = vmatpush3.bf16.msra.mxu1 %v3430_v49 }
 0x1d2   : > { %3177 = vmatprep.subr.bf16.mxu1 %v3431_v54 }
 0x1d4   : > { %3162 = vmatmul.mubr.msk.bf16.gmra.mrb[4].mxu1 %vm500_vm0, %v4089_v60 }
 0x1d5   : > { %3169 = vmatprep.mubr.msk.bf16.mxu1 %vm500_vm0, %v1926_v61 }
 0x1dc   : > { %3170 = vmatmul.mubr.msk.bf16.vlgmr.msra.gmra.mrb[0].mxu1 %vm500_vm0, %v1927_v62 }
 0x1dd   : > { %3178 = vmatpush3.bf16.msra.mxu1 %v3431_v54  ;;  %3173 = vmatprep.mubr.msk.bf16.mxu1 %vm500_vm0, %v1928_v52 }
 0x1de   : > { %3179 = vmatprep.subr.bf16.mxu1 %v3432_v63 }
 0x1e1   : > { %3180 = vmatpush3.bf16.msra.mxu1 %v3432_v63 }
 0x1e2   : > { %3189 = vmatprep.subr.bf16.mxu1 %v3433_v0 }
 0x1e4   : > { %3174 = vmatmul.mubr.msk.bf16.gmra.mrb[4].mxu1 %vm500_vm0, %v1929_v7 }
 0x1e5   : > { %3181 = vmatprep.mubr.msk.bf16.mxu1 %vm500_vm0, %v2040_v8 }
 0x1ec   : > { %3182 = vmatmul.mubr.msk.bf16.vlgmr.msra.gmra.mrb[0].mxu1 %vm500_vm0, %v2041_v4 }
 0x1ed   : > { %3190 = vmatpush3.bf16.msra.mxu1 %v3433_v0  ;;  %3185 = vmatprep.mubr.msk.bf16.mxu1 %vm500_vm0, %v2042_v10 }
 0x1ee   : > { %3191 = vmatprep.subr.bf16.mxu1 %v3434_v9 }
 0x1f1   : > { %3192 = vmatpush3.bf16.msra.mxu1 %v3434_v9 }
 0x1f2   : > { %3201 = vmatprep.subr.bf16.mxu1 %v3435_v12 }
 0x1f4   : > { %3186 = vmatmul.mubr.msk.bf16.gmra.mrb[4].mxu1 %vm500_vm0, %v2043_v14 }
 0x1f5   : > { %3193 = vmatprep.mubr.msk.bf16.mxu1 %vm500_vm0, %v2154_v15 }
 0x1fc   : > { %3194 = vmatmul.mubr.msk.bf16.vlgmr.msra.gmra.mrb[0].mxu1 %vm500_vm0, %v2155_v16 }
 0x1fd   : > { %3202 = vmatpush3.bf16.msra.mxu1 %v3435_v12  ;;  %3197 = vmatprep.mubr.msk.bf16.mxu1 %vm500_vm0, %v2156_v42 }
 0x1fe   : > { %3203 = vmatprep.subr.bf16.mxu1 %v3436_v40 }
 0x201   : > { %3204 = vmatpush3.bf16.msra.mxu1 %v3436_v40 }
 0x202   : > { %3213 = vmatprep.subr.bf16.mxu1 %v3437_v53 }
 0x204   : > { %3198 = vmatmul.mubr.msk.bf16.gmra.mrb[4].mxu1 %vm500_vm0, %v2157_v19 }
 0x205   : > { %3205 = vmatprep.mubr.msk.bf16.mxu1 %vm500_vm0, %v4056_v28 }
 0x20c   : > { %3206 = vmatmul.mubr.msk.bf16.vlgmr.msra.gmra.mrb[0].mxu1 %vm500_vm0, %v4061_v32 }
 0x20d   : > { %3214 = vmatpush3.bf16.msra.mxu1 %v3437_v53  ;;  %3209 = vmatprep.mubr.msk.bf16.mxu1 %vm500_vm0, %v4070_v36 }
 0x20e   : > { %3215 = vmatprep.subr.bf16.mxu1 %v3438_v1 }
 0x211   : > { %3216 = vmatpush3.bf16.msra.mxu1 %v3438_v1 }
 0x212   : > { %3225 = vmatprep.subr.bf16.mxu1 %v3439_v24 }
 0x214   : > { %3210 = vmatmul.mubr.msk.bf16.gmra.mrb[4].mxu1 %vm500_vm0, %v2272_v2 }
 0x215   : > { %3217 = vmatprep.mubr.msk.bf16.mxu1 %vm500_vm0, %v4025_v17  ;;  %v2496_v17 = vld [vmem:[#allocation3 + $0x92] sm:$0xff] }
 0x21c   : > { %3218 = vmatmul.mubr.msk.bf16.vlgmr.msra.gmra.mrb[0].mxu1 %vm500_vm0, %v4041_v11  ;;  %v2500_v11 = vpack.c.bf16 %v2496_v17, %v2153_v18 }
 0x21d   : > { %3226 = vmatpush3.bf16.msra.mxu1 %v3439_v24  ;;  %3221 = vmatprep.mubr.msk.bf16.mxu1 %vm500_vm0, %v4051_v20  ;;  %v2908_v20 = vld [vmem:[%s4232_s6] ss:$0 sm:$0xff] }
 0x21e   : > { %3227 = vmatprep.subr.bf16.mxu1 %v3440_v31 }
 0x221   : > { %3228 = vmatpush3.bf16.msra.mxu1 %v3440_v31 }
 0x224   : > { %3222 = vmatmul.mubr.msk.bf16.gmra.mrb[4].mxu1 %vm500_vm0, %v2386_v25 }
 0x225   : > { %3229 = vmatprep.mubr.msk.bf16.mxu1 %vm500_vm0, %v4075_v47 }
 0x22c   : > { %3230 = vmatmul.mubr.msk.bf16.vlgmr.msra.gmra.mrb[0].mxu1 %vm500_vm0, %v4080_v51 }
 0x22d   : > { %3233 = vmatprep.mubr.msk.bf16.mxu1 %vm500_vm0, %v4089_v60 }
 0x234   : > { %3234 = vmatmul.mubr.msk.bf16.gmra.mrb[4].mxu1 %vm500_vm0, %v2500_v11 }
 0x2ff   : > { %v3231_v27 = vpop.f32.mrb[0].mxu1 }
 0x300   : > { %v2612_v57 = vadd.f32 %v3231_v27, %v2908_v20  ;;  %v2564_v3 = vpop.f32.mrb[1].mxu1 }
 0x301   : > { %v2610_v28 = vadd.f32 %v2908_v20, %v2564_v3  ;;  %v3232_v29 = vpop.f32.mrb[2].mxu1 }
 0x302   : > { %v2613_v30 = vadd.f32 %v3232_v29, %v2908_v20  ;;  %v2567_v32 = vpop.f32.mrb[3].mxu1  ;;  %v2620_v33 = vadd.f32 %v2612_v57, %v3761_v50 }
 0x303   : > { %v2618_v34 = vadd.f32 %v2610_v28, %v3731_v23  ;;  %v2611_v37 = vadd.f32 %v2908_v20, %v2567_v32 }
 0x304   : > { %v2621_v35 = vadd.f32 %v2613_v30, %v3813_v38  ;;  %v2628_v41 = vmax.f32 %v2620_v33, 0.0 }
 0x305   : > { %v2626_v21 = vmax.f32 %v2618_v34, 0.0  ;;  %v2619_v36 = vadd.f32 %v2611_v37, %v3733_v26 }
 0x306   : > { %v2629_v49 = vmax.f32 %v2621_v35, 0.0  ;;  %v2637_v60 = vsel %vm500_vm0, %v2628_v41, 0.0 }
 0x307   : > { %v2627_v44 = vmax.f32 %v2619_v36, 0.0  ;;  %v3235_v45 = vpop.f32.mrb[4].mxu1  ;;  %v2634_v48 = vsel %vm500_vm0, %v2626_v21, 0.0 }
 0x308   : > { %v2616_v46 = vadd.f32 %v3235_v45, %v2908_v20  ;;  %v2580_v47 = vpop.f32.mrb[5].mxu1  ;;  %v2639_v63 = vsel %vm500_vm0, %v2629_v49, 0.0 }
 0x309   : > { %v2635_v51 = vsel %vm500_vm0, %v2627_v44, 0.0  ;;  %v2614_v54 = vadd.f32 %v2908_v20, %v2580_v47  ;;  %v3236_v50 = vpop.f32.mrb[6].mxu1 }
 0x30a   : > { %v2636_v55 = vadd.f32 %v2635_v51, %v2634_v48  ;;  %v2617_v23 = vadd.f32 %v3236_v50, %v2908_v20  ;;  %v2583_v59 = vpop.f32.mrb[7].mxu1  ;;  %v2624_v38 = vadd.f32 %v2616_v46, %v3862_v5 }
 0x30b   : > { %v2622_v26 = vadd.f32 %v2614_v54, %v3815_v39  ;;  %v2615_v61 = vadd.f32 %v2908_v20, %v2583_v59 }
 0x30c   : > { %v2638_v62 = vadd.f32 %v2637_v60, %v2636_v55  ;;  %v2625_v0 = vadd.f32 %v2617_v23, %v3881_v43  ;;  %v2632_v8 = vmax.f32 %v2624_v38, 0.0 }
 0x30d   : > { %v2630_v52 = vmax.f32 %v2622_v26, 0.0  ;;  %v2623_v6 = vadd.f32 %v2615_v61, %v3860_v56 }
 0x30e   : > { %v2640_v7 = vadd.f32 %v2639_v63, %v2638_v62  ;;  %v2633_v5 = vmax.f32 %v2625_v0, 0.0  ;;  %v2645_v13 = vsel %vm500_vm0, %v2632_v8, 0.0 }
 0x30f   : > { %v2641_v4 = vsel %vm500_vm0, %v2630_v52, 0.0  ;;  %v2631_v9 = vmax.f32 %v2623_v6, 0.0 }
 0x310   : > { %v2642_v10 = vadd.f32 %v2641_v4, %v2640_v7  ;;  %v2647_v15 = vsel %vm500_vm0, %v2633_v5, 0.0 }
 0x311   : > { %v2643_v39 = vsel %vm500_vm0, %v2631_v9, 0.0 }
 0x312   : > { %v2644_v12 = vadd.f32 %v2643_v39, %v2642_v10 }
 0x314   : > { %v2646_v14 = vadd.f32 %v2645_v13, %v2644_v12 }
 0x316   : > { %v2648_v43 = vadd.f32 %v2647_v15, %v2646_v14 }
 0x318   : > { %v2649_v16 = vrot.slane %v2648_v43, 4 }
 0x31a   : > { %v2650_v40 = vadd.f32 %v2649_v16, %v2648_v43 }
 0x31c   : > { %v2651_v56 = vrot.slane %v2650_v40, 2 }
 0x31e   : > { %v2652_v42 = vadd.f32 %v2651_v56, %v2650_v40 }
 0x320   : > { %v2653_v53 = vrot.slane %v2652_v42, 1 }
 0x322   : > { %v2654_v18 = vadd.f32 %v2653_v53, %v2652_v42 }
 0x324   : > { %v2656_v19 = vmul.f32 0.015625, %v2654_v18 }
 0x326   : > { %2658 = vst.msk [vmem:[%s270_s16] sm:$0x1] %vm2657_vm3, %v2656_v19 }
 0x327   : > { %3454 = shalt.err (!%p3451_p3)
}
 0x328   : > { %s3455_s8 = scalar_lea.hbm %s4184_s20, 16  ;;  %s3459_s14 = scalar_lea.hbm %s4233_s7, 32 }
 0x329   : > { %p3456_p4 = scmp.ne.s32.totalorder %s4184_s20, %s3455_s8  ;;  %p3460_p9 = scmp.lt.u32.totalorder %s4184_s20, %s4233_s7 }
 0x32a   : > { %p3461_p10 = scmp.lt.u32.totalorder %s3459_s14, %s3455_s8  ;;  %p3463_p12 = scmp.lt.u32.totalorder %s3455_s8, %s4184_s20 }
 0x32b   : > { %p3457_p7 = pnand %p3456_p4, %p3585_p5 }
 0x32c   : > { %p3462_p11 = por %p3461_p10, %p3460_p9 }
 0x32d   : > { %p3458_p8 = pneg %p3457_p7 }
 0x32e   : > { %p3464_p13 = por %p3463_p12, %p3462_p11 }
 0x330   : > { %p3465_p0 = pnand %p3464_p13, %p3458_p8 }
 0x332   : > { %3468 = shalt.err (!%p3465_p0)
}
 0x333   : > { %3365 = dma.vmem_to_hbm [thread:$0]  (%p3585_p5), %s4186_s17, 16, %s4184_s20, %s2660_s21  }
 0x334 PF: > { %p3371_p1 = scmp.ge.s32.totalorder %s3503_s27, 2  ;;  %s2684_s18 = sand.u32 1, %s3491_s24  }
 0x335   : > { %s2685_s19 = scalar_lea.sflag [#allocation5], %s2684_s18 }
 0x336   : > { %p3368_p2 = pnand %p3371_p1, %p3589_p6 }
 0x338   : > { %3486 = dma.done.wait (!%p3368_p2), %s2685_s19, 16  }
 0x339   : > { %3488 = vsyncadd (!%p3368_p2), %s2685_s19, 4294967280  ;;  %p17_p3 = scmp.ge.s32.totalorder %s3572_s30, 4   ;;  %s4236_s24 = smov %s3495_s25 }
 0x33a   : > { %s4237_s25 = smov %s3499_s26  ;;  %s4238_s26 = smov %s3583_s10 }
 0x33b   : > { %s4239_s27 = smov %s3572_s30  ;;  %19 = sbr.rel (!%p17_p3) target bundleno = 3 (0x3), region = 103 }
 0x342   :  { %2689 = vsyncpa [#allocation5], 1 }
 0x343   :  { %2691 = vsyncpa [#allocation5 + $0x1], 1 }

</bundles_post_ra>
